<compile_context>
chip_gen: v6e
topology: v6e:2x2x1
jax: 0.10.0
libtpu: 0.0.40
codegen_flags: <defaults>
</compile_context>

<pallas_src>
import functools

import jax
import jax.numpy as jnp
from jax import lax
from jax.experimental import pallas as pl
from jax.experimental.pallas import tpu as pltpu

BLOCKSIZ = 128                 # max context (tril buffer size in the module)
NEMB = 158                     # embedding size (module-level constant)
NHEAD = 4
HEADSIZ = NEMB // NHEAD        # = 39 (usual nhead*headsiz ~ nemb choice)

CP = 256                       # NEMB padded to a multiple of 128 (lane-dense)
HP = 128                       # HEADSIZ padded to a full lane width
QKV_F = 3 * NHEAD * HP         # fused q|k|v projection width = 1536

# TODO(synk): nn.Dropout(0.2) is stochastic in train mode; implemented as
#             identity (eval-mode deterministic forward).


def _mha_kernel(x_ref, wqkv_ref, wproj_ref, bproj_ref, o_ref, acc_ref):
    """One grid step = BT batch elements.

    x_ref     : (BT, Tp, CP)      compute dtype (f32 or bf16), zero-padded
    wqkv_ref  : (CP, 3*NHEAD*HP)  fused q|k|v projection weights, zero-padded
    wproj_ref : (NHEAD, HP, CP)   per-head output projection, zero-padded
    bproj_ref : (1, CP)           f32 bias, zero-padded
    o_ref     : (BT, Tp, CP)      f32 output
    acc_ref   : (BT, Tp, CP)      f32 VMEM accumulator scratch
    """
    bt, tp, cp = x_ref.shape
    dt = x_ref.dtype

    # Fused q/k/v projection: one big lane-dense matmul on the MXU.
    x2 = x_ref[...].reshape(bt * tp, cp)
    qkv = jnp.dot(x2, wqkv_ref[...], preferred_element_type=jnp.float32)
    qkv = qkv.reshape(bt, tp, QKV_F).astype(dt)

    # Additive causal mask, built once per grid step.
    row = lax.broadcasted_iota(jnp.int32, (tp, tp), 0)
    col = lax.broadcasted_iota(jnp.int32, (tp, tp), 1)
    neg_mask = jnp.where(col <= row, 0.0, -1e30).astype(jnp.float32)

    scale = jnp.float32(float(HEADSIZ) ** -0.5)   # true head size (39), not HP

    for h in range(NHEAD):                        # static unroll, NHEAD = 4
        qh = qkv[:, :, h * HP:(h + 1) * HP]
        kh = qkv[:, :, (NHEAD + h) * HP:(NHEAD + h + 1) * HP]
        vh = qkv[:, :, (2 * NHEAD + h) * HP:(2 * NHEAD + h + 1) * HP]

        # (BT, T, T) scores: batched contraction over head dim, no explicit k.T.
        s = jnp.einsum('bqd,bkd->bqk', qh, kh,
                       preferred_element_type=jnp.float32)
        s = s * scale + neg_mask

        # Softmax in f32 (diagonal always unmasked -> no all--inf rows).
        s = s - jnp.max(s, axis=-1, keepdims=True)
        p = jnp.exp(s)
        denom = jnp.sum(p, axis=-1, keepdims=True)
        p = p * pl.reciprocal(denom, approx=True)

        oh = jnp.einsum('bqk,bkd->bqd', p.astype(dt), vh,
                        preferred_element_type=jnp.float32)   # (BT, Tp, HP)

        # Output projection accumulated per head (replaces the concat).
        contrib = jnp.dot(oh.reshape(bt * tp, HP).astype(dt), wproj_ref[h],
                          preferred_element_type=jnp.float32)
        contrib = contrib.reshape(bt, tp, cp)
        if h == 0:
            acc_ref[...] = contrib
        else:
            acc_ref[...] += contrib

    o_ref[...] = (acc_ref[...] + bproj_ref[...].astype(jnp.float32)
                  ).astype(o_ref.dtype)


def _pad2(w, rows, cols):
    return jnp.pad(w, ((0, rows - w.shape[0]), (0, cols - w.shape[1])))


def _pick_block_batch(B):
    """Largest batch block in (8,4,2,1) dividing B, keeping >=2 grid steps
    when B > 1 so both v7x TensorCores get work."""
    divisors = [bt for bt in (8, 4, 2, 1) if B % bt == 0]
    for bt in divisors:
        if B // bt >= 2:
            return bt
    return divisors[-1]        # B == 1


@functools.partial(jax.jit, static_argnames=("compute_dtype",))
def multi_head_attention(x, wq, wk, wv, wproj, bproj,
                         compute_dtype=jnp.float32):
    """x: (B, T, NEMB) f32. wq/wk/wv: (NHEAD, NEMB, HEADSIZ) stored as
    (in, out) so y = x @ W. wproj: (NHEAD*HEADSIZ, NEMB). bproj: (NEMB,)."""
    B, T, C = x.shape
    assert C == NEMB and T <= BLOCKSIZ

    Tp = ((T + 7) // 8) * 8            # sublane-friendly sequence pad (exact:
    BT = _pick_block_batch(B)          # padded key cols are causally masked)

    # Zero-padded, lane-dense operands (math stays exact; output sliced back).
    x_p = jnp.pad(x, ((0, 0), (0, Tp - T), (0, CP - NEMB))).astype(compute_dtype)
    wqkv = jnp.concatenate(
        [_pad2(wq[h], CP, HP) for h in range(NHEAD)]
        + [_pad2(wk[h], CP, HP) for h in range(NHEAD)]
        + [_pad2(wv[h], CP, HP) for h in range(NHEAD)],
        axis=1).astype(compute_dtype)                           # (CP, 1536)
    wproj_p = jnp.stack(
        [_pad2(wproj[h * HEADSIZ:(h + 1) * HEADSIZ], HP, CP)
         for h in range(NHEAD)]).astype(compute_dtype)          # (NHEAD, HP, CP)
    bproj_p = jnp.pad(bproj, (0, CP - NEMB)).reshape(1, CP).astype(jnp.float32)

    out_p = pl.pallas_call(
        _mha_kernel,
        out_shape=jax.ShapeDtypeStruct((B, Tp, CP), jnp.float32),
        grid_spec=pltpu.PrefetchScalarGridSpec(
            num_scalar_prefetch=0,
            grid=(B // BT,),
            in_specs=[
                pl.BlockSpec((BT, Tp, CP), lambda b: (b, 0, 0)),
                pl.BlockSpec((CP, QKV_F), lambda b: (0, 0)),
                pl.BlockSpec((NHEAD, HP, CP), lambda b: (0, 0, 0)),
                pl.BlockSpec((1, CP), lambda b: (0, 0)),
            ],
            out_specs=pl.BlockSpec((BT, Tp, CP), lambda b: (b, 0, 0)),
            scratch_shapes=[pltpu.VMEM((BT, Tp, CP), jnp.float32)],
        ),
        compiler_params=pltpu.CompilerParams(
            dimension_semantics=("parallel",)),
    )(x_p, wqkv, wproj_p, bproj_p)

    return out_p[:, :T, :NEMB].astype(x.dtype)


def reference_mha(x, wq, wk, wv, wproj, bproj):
    """Pure-JAX reference matching the PyTorch forward (eval mode)."""
    B, T, C = x.shape
    scale = float(HEADSIZ) ** -0.5
    tril = jnp.tril(jnp.ones((T, T), dtype=bool))
    outs = []
    for h in range(NHEAD):
        q = x @ wq[h]
        k = x @ wk[h]
        v = x @ wv[h]
        w = (q @ jnp.swapaxes(k, -1, -2)) * scale
        w = jnp.where(tril, w, -jnp.inf)
        w = jax.nn.softmax(w, axis=-1)
        outs.append(w @ v)
    cat = jnp.concatenate(outs, axis=-1)
    return cat @ wproj + bproj


if __name__ == "__main__":
    key = jax.random.PRNGKey(0)
    k_x, k_q, k_k, k_v, k_p, k_b = jax.random.split(key, 6)

    B, T = 2, 8
    x = jax.random.normal(k_x, (B, T, NEMB), dtype=jnp.float32)

    # Deterministic synthetic parameters (stored as (in, out) so y = x @ W).
    wq = 0.05 * jax.random.normal(k_q, (NHEAD, NEMB, HEADSIZ), dtype=jnp.float32)
    wk = 0.05 * jax.random.normal(k_k, (NHEAD, NEMB, HEADSIZ), dtype=jnp.float32)
    wv = 0.05 * jax.random.normal(k_v, (NHEAD, NEMB, HEADSIZ), dtype=jnp.float32)
    wproj = 0.05 * jax.random.normal(k_p, (NHEAD * HEADSIZ, NEMB), dtype=jnp.float32)
    bproj = 0.05 * jax.random.normal(k_b, (NEMB,), dtype=jnp.float32)

    ref = reference_mha(x, wq, wk, wv, wproj, bproj)

    # f32 path (tolerance slightly loosened only for the approx EUP reciprocal).
    out_f32 = jax.block_until_ready(
        multi_head_attention(x, wq, wk, wv, wproj, bproj,
                             compute_dtype=jnp.float32))
    assert out_f32.shape == (B, T, NEMB)
    assert jnp.allclose(out_f32, ref, atol=5e-3, rtol=5e-3), (
        float(jnp.max(jnp.abs(out_f32 - ref))))

    # bf16 MXU-input path (f32 accumulation), the v6e/v7x fast path.
    out_bf16 = jax.block_until_ready(
        multi_head_attention(x, wq, wk, wv, wproj, bproj,
                             compute_dtype=jnp.bfloat16))
    assert out_bf16.shape == (B, T, NEMB)
    assert jnp.allclose(out_bf16, ref, atol=1e-1, rtol=1e-1), (
        float(jnp.max(jnp.abs(out_bf16 - ref))))

    print("KERNEL_OK")
</pallas_src>

<mosaic_0001>
module attributes {stable_mosaic.version = 11 : i64} {
  func.func @_mha_kernel(%arg0: i32, %arg1: memref<1x8x256xf32, #tpu.memory_space<vmem>>, %arg2: memref<256x1536xf32, #tpu.memory_space<vmem>>, %arg3: memref<4x128x256xf32, #tpu.memory_space<vmem>>, %arg4: memref<1x256xf32, #tpu.memory_space<vmem>>, %arg5: memref<1x8x256xf32, #tpu.memory_space<vmem>>, %arg6: memref<1x8x256xf32, #tpu.memory_space<vmem>>) attributes {dimension_semantics = [#tpu.dimension_semantics<parallel>], iteration_bounds = array<i64: 2>, scalar_prefetch = 0 : i64, scratch_operands = 1 : i64, tpu.core_type = #tpu.core_type<tc>, window_params = [{transform_indices = @transform_0, window_bounds = array<i64: 1, 8, 256>}, {pipeline_mode = #tpu.pipeline_mode<synchronous>, transform_indices = @transform_1, window_bounds = array<i64: 256, 1536>}, {pipeline_mode = #tpu.pipeline_mode<synchronous>, transform_indices = @transform_2, window_bounds = array<i64: 4, 128, 256>}, {pipeline_mode = #tpu.pipeline_mode<synchronous>, transform_indices = @transform_3, window_bounds = array<i64: 1, 256>}, {transform_indices = @transform_4, window_bounds = array<i64: 1, 8, 256>}]} {
    %c0 = arith.constant 0 : index
    %c0_0 = arith.constant 0 : index
    %c0_1 = arith.constant 0 : index
    %0 = vector.load %arg1[%c0, %c0_0, %c0_1] : memref<1x8x256xf32, #tpu.memory_space<vmem>>, vector<1x8x256xf32>
    %1 = vector.shape_cast %0 : vector<1x8x256xf32> to vector<8x256xf32>
    %c0_2 = arith.constant 0 : index
    %c0_3 = arith.constant 0 : index
    %2 = vector.load %arg2[%c0_2, %c0_3] : memref<256x1536xf32, #tpu.memory_space<vmem>>, vector<256x1536xf32>
    %cst = arith.constant dense<0.000000e+00> : vector<8x1536xf32>
    %3 = tpu.matmul %1, %2, %cst {dimension_numbers = #tpu.dot_dimension_numbers<[1], [0], [0], [1], [0, 0, 1, 1], [], []>} : vector<8x256xf32>, vector<256x1536xf32>, vector<8x1536xf32> -> vector<8x1536xf32>
    %4 = vector.shape_cast %3 : vector<8x1536xf32> to vector<1x8x1536xf32>
    %5 = tpu.iota {dimensions = array<i32: 0>} : vector<8x8xi32>
    %6 = tpu.iota {dimensions = array<i32: 1>} : vector<8x8xi32>
    %7 = arith.cmpi sle, %6, %5 : vector<8x8xi32>
    %cst_4 = arith.constant 0.000000e+00 : f32
    %cst_5 = arith.constant -1.000000e+30 : f32
    %8 = vector.broadcast %cst_4 : f32 to vector<8x8xf32>
    %9 = vector.broadcast %cst_5 : f32 to vector<8x8xf32>
    %10 = arith.select %7, %8, %9 : vector<8x8xi1>, vector<8x8xf32>
    %11 = vector.extract_strided_slice %4 {offsets = [0, 0, 0], sizes = [1, 8, 128], strides = [1, 1, 1]} : vector<1x8x1536xf32> to vector<1x8x128xf32>
    %12 = vector.extract_strided_slice %4 {offsets = [0, 0, 512], sizes = [1, 8, 128], strides = [1, 1, 1]} : vector<1x8x1536xf32> to vector<1x8x128xf32>
    %13 = vector.extract_strided_slice %4 {offsets = [0, 0, 1024], sizes = [1, 8, 128], strides = [1, 1, 1]} : vector<1x8x1536xf32> to vector<1x8x128xf32>
    "tpu.trace_start"() <{level = 10 : i32, message = "bqd,bkd->bqk"}> : () -> ()
    %cst_6 = arith.constant dense<0.000000e+00> : vector<1x8x8xf32>
    %14 = tpu.matmul %11, %12, %cst_6 {dimension_numbers = #tpu.dot_dimension_numbers<[2], [2], [1], [1], [0, 0, 0, 1, 1, 1], [0], [0]>} : vector<1x8x128xf32>, vector<1x8x128xf32>, vector<1x8x8xf32> -> vector<1x8x8xf32>
    "tpu.trace_stop"() : () -> ()
    %cst_7 = arith.constant 0.160128146 : f32
    %15 = vector.broadcast %cst_7 : f32 to vector<1x8x8xf32>
    %16 = arith.mulf %14, %15 : vector<1x8x8xf32>
    %17 = vector.shape_cast %10 : vector<8x8xf32> to vector<1x8x8xf32>
    %18 = arith.addf %16, %17 : vector<1x8x8xf32>
    %cst_8 = arith.constant dense<0xFF800000> : vector<1x8xf32>
    %19 = vector.multi_reduction <maximumf>, %18, %cst_8 [2] : vector<1x8x8xf32> to vector<1x8xf32>
    %20 = vector.shape_cast %19 : vector<1x8xf32> to vector<1x8x1xf32>
    %21 = vector.broadcast %20 : vector<1x8x1xf32> to vector<1x8x8xf32>
    %22 = arith.subf %18, %21 : vector<1x8x8xf32>
    %23 = math.exp %22 : vector<1x8x8xf32>
    %cst_9 = arith.constant dense<0.000000e+00> : vector<1x8xf32>
    %24 = vector.multi_reduction <add>, %23, %cst_9 [2] : vector<1x8x8xf32> to vector<1x8xf32>
    %25 = vector.shape_cast %24 : vector<1x8xf32> to vector<1x8x1xf32>
    %26 = tpu.reciprocal %25 {approx = true} : vector<1x8x1xf32> -> vector<1x8x1xf32>
    %27 = vector.broadcast %26 : vector<1x8x1xf32> to vector<1x8x8xf32>
    %28 = arith.mulf %23, %27 : vector<1x8x8xf32>
    "tpu.trace_start"() <{level = 10 : i32, message = "bqk,bkd->bqd"}> : () -> ()
    %cst_10 = arith.constant dense<0.000000e+00> : vector<1x8x128xf32>
    %29 = tpu.matmul %28, %13, %cst_10 {dimension_numbers = #tpu.dot_dimension_numbers<[2], [1], [1], [2], [0, 0, 0, 1, 1, 2], [0], [0]>} : vector<1x8x8xf32>, vector<1x8x128xf32>, vector<1x8x128xf32> -> vector<1x8x128xf32>
    "tpu.trace_stop"() : () -> ()
    %30 = vector.shape_cast %29 : vector<1x8x128xf32> to vector<8x128xf32>
    %c0_11 = arith.constant 0 : index
    %c0_12 = arith.constant 0 : index
    %c0_13 = arith.constant 0 : index
    %31 = vector.load %arg3[%c0_11, %c0_12, %c0_13] : memref<4x128x256xf32, #tpu.memory_space<vmem>>, vector<1x128x256xf32>
    %32 = vector.shape_cast %31 : vector<1x128x256xf32> to vector<128x256xf32>
    %cst_14 = arith.constant dense<0.000000e+00> : vector<8x256xf32>
    %33 = tpu.matmul %30, %32, %cst_14 {dimension_numbers = #tpu.dot_dimension_numbers<[1], [0], [0], [1], [0, 0, 1, 1], [], []>} : vector<8x128xf32>, vector<128x256xf32>, vector<8x256xf32> -> vector<8x256xf32>
    %34 = vector.shape_cast %33 : vector<8x256xf32> to vector<1x8x256xf32>
    %c0_15 = arith.constant 0 : index
    %c0_16 = arith.constant 0 : index
    %c0_17 = arith.constant 0 : index
    %35 = vector.load %arg6[%c0_15, %c0_16, %c0_17] : memref<1x8x256xf32, #tpu.memory_space<vmem>>, vector<1x8x256xf32>
    tpu.vector_store %arg6[%c0_15, %c0_16, %c0_17], %34 {strides = array<i32>} : memref<1x8x256xf32, #tpu.memory_space<vmem>>, vector<1x8x256xf32>,
    %36 = vector.extract_strided_slice %4 {offsets = [0, 0, 128], sizes = [1, 8, 128], strides = [1, 1, 1]} : vector<1x8x1536xf32> to vector<1x8x128xf32>
    %37 = vector.extract_strided_slice %4 {offsets = [0, 0, 640], sizes = [1, 8, 128], strides = [1, 1, 1]} : vector<1x8x1536xf32> to vector<1x8x128xf32>
    %38 = vector.extract_strided_slice %4 {offsets = [0, 0, 1152], sizes = [1, 8, 128], strides = [1, 1, 1]} : vector<1x8x1536xf32> to vector<1x8x128xf32>
    "tpu.trace_start"() <{level = 10 : i32, message = "bqd,bkd->bqk"}> : () -> ()
    %cst_18 = arith.constant dense<0.000000e+00> : vector<1x8x8xf32>
    %39 = tpu.matmul %36, %37, %cst_18 {dimension_numbers = #tpu.dot_dimension_numbers<[2], [2], [1], [1], [0, 0, 0, 1, 1, 1], [0], [0]>} : vector<1x8x128xf32>, vector<1x8x128xf32>, vector<1x8x8xf32> -> vector<1x8x8xf32>
    "tpu.trace_stop"() : () -> ()
    %cst_19 = arith.constant 0.160128146 : f32
    %40 = vector.broadcast %cst_19 : f32 to vector<1x8x8xf32>
    %41 = arith.mulf %39, %40 : vector<1x8x8xf32>
    %42 = vector.shape_cast %10 : vector<8x8xf32> to vector<1x8x8xf32>
    %43 = arith.addf %41, %42 : vector<1x8x8xf32>
    %cst_20 = arith.constant dense<0xFF800000> : vector<1x8xf32>
    %44 = vector.multi_reduction <maximumf>, %43, %cst_20 [2] : vector<1x8x8xf32> to vector<1x8xf32>
    %45 = vector.shape_cast %44 : vector<1x8xf32> to vector<1x8x1xf32>
    %46 = vector.broadcast %45 : vector<1x8x1xf32> to vector<1x8x8xf32>
    %47 = arith.subf %43, %46 : vector<1x8x8xf32>
    %48 = math.exp %47 : vector<1x8x8xf32>
    %cst_21 = arith.constant dense<0.000000e+00> : vector<1x8xf32>
    %49 = vector.multi_reduction <add>, %48, %cst_21 [2] : vector<1x8x8xf32> to vector<1x8xf32>
    %50 = vector.shape_cast %49 : vector<1x8xf32> to vector<1x8x1xf32>
    %51 = tpu.reciprocal %50 {approx = true} : vector<1x8x1xf32> -> vector<1x8x1xf32>
    %52 = vector.broadcast %51 : vector<1x8x1xf32> to vector<1x8x8xf32>
    %53 = arith.mulf %48, %52 : vector<1x8x8xf32>
    "tpu.trace_start"() <{level = 10 : i32, message = "bqk,bkd->bqd"}> : () -> ()
    %cst_22 = arith.constant dense<0.000000e+00> : vector<1x8x128xf32>
    %54 = tpu.matmul %53, %38, %cst_22 {dimension_numbers = #tpu.dot_dimension_numbers<[2], [1], [1], [2], [0, 0, 0, 1, 1, 2], [0], [0]>} : vector<1x8x8xf32>, vector<1x8x128xf32>, vector<1x8x128xf32> -> vector<1x8x128xf32>
    "tpu.trace_stop"() : () -> ()
    %55 = vector.shape_cast %54 : vector<1x8x128xf32> to vector<8x128xf32>
    %c1 = arith.constant 1 : index
    %c0_23 = arith.constant 0 : index
    %c0_24 = arith.constant 0 : index
    %56 = vector.load %arg3[%c1, %c0_23, %c0_24] : memref<4x128x256xf32, #tpu.memory_space<vmem>>, vector<1x128x256xf32>
    %57 = vector.shape_cast %56 : vector<1x128x256xf32> to vector<128x256xf32>
    %cst_25 = arith.constant dense<0.000000e+00> : vector<8x256xf32>
    %58 = tpu.matmul %55, %57, %cst_25 {dimension_numbers = #tpu.dot_dimension_numbers<[1], [0], [0], [1], [0, 0, 1, 1], [], []>} : vector<8x128xf32>, vector<128x256xf32>, vector<8x256xf32> -> vector<8x256xf32>
    %59 = vector.shape_cast %58 : vector<8x256xf32> to vector<1x8x256xf32>
    %c0_26 = arith.constant 0 : index
    %c0_27 = arith.constant 0 : index
    %c0_28 = arith.constant 0 : index
    %60 = vector.load %arg6[%c0_26, %c0_27, %c0_28] : memref<1x8x256xf32, #tpu.memory_space<vmem>>, vector<1x8x256xf32>
    %61 = arith.addf %60, %59 : vector<1x8x256xf32>
    %c0_29 = arith.constant 0 : index
    %c0_30 = arith.constant 0 : index
    %c0_31 = arith.constant 0 : index
    %62 = vector.load %arg6[%c0_29, %c0_30, %c0_31] : memref<1x8x256xf32, #tpu.memory_space<vmem>>, vector<1x8x256xf32>
    tpu.vector_store %arg6[%c0_29, %c0_30, %c0_31], %61 {strides = array<i32>} : memref<1x8x256xf32, #tpu.memory_space<vmem>>, vector<1x8x256xf32>,
    %63 = vector.extract_strided_slice %4 {offsets = [0, 0, 256], sizes = [1, 8, 128], strides = [1, 1, 1]} : vector<1x8x1536xf32> to vector<1x8x128xf32>
    %64 = vector.extract_strided_slice %4 {offsets = [0, 0, 768], sizes = [1, 8, 128], strides = [1, 1, 1]} : vector<1x8x1536xf32> to vector<1x8x128xf32>
    %65 = vector.extract_strided_slice %4 {offsets = [0, 0, 1280], sizes = [1, 8, 128], strides = [1, 1, 1]} : vector<1x8x1536xf32> to vector<1x8x128xf32>
    "tpu.trace_start"() <{level = 10 : i32, message = "bqd,bkd->bqk"}> : () -> ()
    %cst_32 = arith.constant dense<0.000000e+00> : vector<1x8x8xf32>
    %66 = tpu.matmul %63, %64, %cst_32 {dimension_numbers = #tpu.dot_dimension_numbers<[2], [2], [1], [1], [0, 0, 0, 1, 1, 1], [0], [0]>} : vector<1x8x128xf32>, vector<1x8x128xf32>, vector<1x8x8xf32> -> vector<1x8x8xf32>
    "tpu.trace_stop"() : () -> ()
    %cst_33 = arith.constant 0.160128146 : f32
    %67 = vector.broadcast %cst_33 : f32 to vector<1x8x8xf32>
    %68 = arith.mulf %66, %67 : vector<1x8x8xf32>
    %69 = vector.shape_cast %10 : vector<8x8xf32> to vector<1x8x8xf32>
    %70 = arith.addf %68, %69 : vector<1x8x8xf32>
    %cst_34 = arith.constant dense<0xFF800000> : vector<1x8xf32>
    %71 = vector.multi_reduction <maximumf>, %70, %cst_34 [2] : vector<1x8x8xf32> to vector<1x8xf32>
    %72 = vector.shape_cast %71 : vector<1x8xf32> to vector<1x8x1xf32>
    %73 = vector.broadcast %72 : vector<1x8x1xf32> to vector<1x8x8xf32>
    %74 = arith.subf %70, %73 : vector<1x8x8xf32>
    %75 = math.exp %74 : vector<1x8x8xf32>
    %cst_35 = arith.constant dense<0.000000e+00> : vector<1x8xf32>
    %76 = vector.multi_reduction <add>, %75, %cst_35 [2] : vector<1x8x8xf32> to vector<1x8xf32>
    %77 = vector.shape_cast %76 : vector<1x8xf32> to vector<1x8x1xf32>
    %78 = tpu.reciprocal %77 {approx = true} : vector<1x8x1xf32> -> vector<1x8x1xf32>
    %79 = vector.broadcast %78 : vector<1x8x1xf32> to vector<1x8x8xf32>
    %80 = arith.mulf %75, %79 : vector<1x8x8xf32>
    "tpu.trace_start"() <{level = 10 : i32, message = "bqk,bkd->bqd"}> : () -> ()
    %cst_36 = arith.constant dense<0.000000e+00> : vector<1x8x128xf32>
    %81 = tpu.matmul %80, %65, %cst_36 {dimension_numbers = #tpu.dot_dimension_numbers<[2], [1], [1], [2], [0, 0, 0, 1, 1, 2], [0], [0]>} : vector<1x8x8xf32>, vector<1x8x128xf32>, vector<1x8x128xf32> -> vector<1x8x128xf32>
    "tpu.trace_stop"() : () -> ()
    %82 = vector.shape_cast %81 : vector<1x8x128xf32> to vector<8x128xf32>
    %c2 = arith.constant 2 : index
    %c0_37 = arith.constant 0 : index
    %c0_38 = arith.constant 0 : index
    %83 = vector.load %arg3[%c2, %c0_37, %c0_38] : memref<4x128x256xf32, #tpu.memory_space<vmem>>, vector<1x128x256xf32>
    %84 = vector.shape_cast %83 : vector<1x128x256xf32> to vector<128x256xf32>
    %cst_39 = arith.constant dense<0.000000e+00> : vector<8x256xf32>
    %85 = tpu.matmul %82, %84, %cst_39 {dimension_numbers = #tpu.dot_dimension_numbers<[1], [0], [0], [1], [0, 0, 1, 1], [], []>} : vector<8x128xf32>, vector<128x256xf32>, vector<8x256xf32> -> vector<8x256xf32>
    %86 = vector.shape_cast %85 : vector<8x256xf32> to vector<1x8x256xf32>
    %c0_40 = arith.constant 0 : index
    %c0_41 = arith.constant 0 : index
    %c0_42 = arith.constant 0 : index
    %87 = vector.load %arg6[%c0_40, %c0_41, %c0_42] : memref<1x8x256xf32, #tpu.memory_space<vmem>>, vector<1x8x256xf32>
    %88 = arith.addf %87, %86 : vector<1x8x256xf32>
    %c0_43 = arith.constant 0 : index
    %c0_44 = arith.constant 0 : index
    %c0_45 = arith.constant 0 : index
    %89 = vector.load %arg6[%c0_43, %c0_44, %c0_45] : memref<1x8x256xf32, #tpu.memory_space<vmem>>, vector<1x8x256xf32>
    tpu.vector_store %arg6[%c0_43, %c0_44, %c0_45], %88 {strides = array<i32>} : memref<1x8x256xf32, #tpu.memory_space<vmem>>, vector<1x8x256xf32>,
    %90 = vector.extract_strided_slice %4 {offsets = [0, 0, 384], sizes = [1, 8, 128], strides = [1, 1, 1]} : vector<1x8x1536xf32> to vector<1x8x128xf32>
    %91 = vector.extract_strided_slice %4 {offsets = [0, 0, 896], sizes = [1, 8, 128], strides = [1, 1, 1]} : vector<1x8x1536xf32> to vector<1x8x128xf32>
    %92 = vector.extract_strided_slice %4 {offsets = [0, 0, 1408], sizes = [1, 8, 128], strides = [1, 1, 1]} : vector<1x8x1536xf32> to vector<1x8x128xf32>
    "tpu.trace_start"() <{level = 10 : i32, message = "bqd,bkd->bqk"}> : () -> ()
    %cst_46 = arith.constant dense<0.000000e+00> : vector<1x8x8xf32>
    %93 = tpu.matmul %90, %91, %cst_46 {dimension_numbers = #tpu.dot_dimension_numbers<[2], [2], [1], [1], [0, 0, 0, 1, 1, 1], [0], [0]>} : vector<1x8x128xf32>, vector<1x8x128xf32>, vector<1x8x8xf32> -> vector<1x8x8xf32>
    "tpu.trace_stop"() : () -> ()
    %cst_47 = arith.constant 0.160128146 : f32
    %94 = vector.broadcast %cst_47 : f32 to vector<1x8x8xf32>
    %95 = arith.mulf %93, %94 : vector<1x8x8xf32>
    %96 = vector.shape_cast %10 : vector<8x8xf32> to vector<1x8x8xf32>
    %97 = arith.addf %95, %96 : vector<1x8x8xf32>
    %cst_48 = arith.constant dense<0xFF800000> : vector<1x8xf32>
    %98 = vector.multi_reduction <maximumf>, %97, %cst_48 [2] : vector<1x8x8xf32> to vector<1x8xf32>
    %99 = vector.shape_cast %98 : vector<1x8xf32> to vector<1x8x1xf32>
    %100 = vector.broadcast %99 : vector<1x8x1xf32> to vector<1x8x8xf32>
    %101 = arith.subf %97, %100 : vector<1x8x8xf32>
    %102 = math.exp %101 : vector<1x8x8xf32>
    %cst_49 = arith.constant dense<0.000000e+00> : vector<1x8xf32>
    %103 = vector.multi_reduction <add>, %102, %cst_49 [2] : vector<1x8x8xf32> to vector<1x8xf32>
    %104 = vector.shape_cast %103 : vector<1x8xf32> to vector<1x8x1xf32>
    %105 = tpu.reciprocal %104 {approx = true} : vector<1x8x1xf32> -> vector<1x8x1xf32>
    %106 = vector.broadcast %105 : vector<1x8x1xf32> to vector<1x8x8xf32>
    %107 = arith.mulf %102, %106 : vector<1x8x8xf32>
    "tpu.trace_start"() <{level = 10 : i32, message = "bqk,bkd->bqd"}> : () -> ()
    %cst_50 = arith.constant dense<0.000000e+00> : vector<1x8x128xf32>
    %108 = tpu.matmul %107, %92, %cst_50 {dimension_numbers = #tpu.dot_dimension_numbers<[2], [1], [1], [2], [0, 0, 0, 1, 1, 2], [0], [0]>} : vector<1x8x8xf32>, vector<1x8x128xf32>, vector<1x8x128xf32> -> vector<1x8x128xf32>
    "tpu.trace_stop"() : () -> ()
    %109 = vector.shape_cast %108 : vector<1x8x128xf32> to vector<8x128xf32>
    %c3 = arith.constant 3 : index
    %c0_51 = arith.constant 0 : index
    %c0_52 = arith.constant 0 : index
    %110 = vector.load %arg3[%c3, %c0_51, %c0_52] : memref<4x128x256xf32, #tpu.memory_space<vmem>>, vector<1x128x256xf32>
    %111 = vector.shape_cast %110 : vector<1x128x256xf32> to vector<128x256xf32>
    %cst_53 = arith.constant dense<0.000000e+00> : vector<8x256xf32>
    %112 = tpu.matmul %109, %111, %cst_53 {dimension_numbers = #tpu.dot_dimension_numbers<[1], [0], [0], [1], [0, 0, 1, 1], [], []>} : vector<8x128xf32>, vector<128x256xf32>, vector<8x256xf32> -> vector<8x256xf32>
    %113 = vector.shape_cast %112 : vector<8x256xf32> to vector<1x8x256xf32>
    %c0_54 = arith.constant 0 : index
    %c0_55 = arith.constant 0 : index
    %c0_56 = arith.constant 0 : index
    %114 = vector.load %arg6[%c0_54, %c0_55, %c0_56] : memref<1x8x256xf32, #tpu.memory_space<vmem>>, vector<1x8x256xf32>
    %115 = arith.addf %114, %113 : vector<1x8x256xf32>
    %c0_57 = arith.constant 0 : index
    %c0_58 = arith.constant 0 : index
    %c0_59 = arith.constant 0 : index
    %116 = vector.load %arg6[%c0_57, %c0_58, %c0_59] : memref<1x8x256xf32, #tpu.memory_space<vmem>>, vector<1x8x256xf32>
    tpu.vector_store %arg6[%c0_57, %c0_58, %c0_59], %115 {strides = array<i32>} : memref<1x8x256xf32, #tpu.memory_space<vmem>>, vector<1x8x256xf32>,
    %c0_60 = arith.constant 0 : index
    %c0_61 = arith.constant 0 : index
    %c0_62 = arith.constant 0 : index
    %117 = vector.load %arg6[%c0_60, %c0_61, %c0_62] : memref<1x8x256xf32, #tpu.memory_space<vmem>>, vector<1x8x256xf32>
    %c0_63 = arith.constant 0 : index
    %c0_64 = arith.constant 0 : index
    %118 = vector.load %arg4[%c0_63, %c0_64] : memref<1x256xf32, #tpu.memory_space<vmem>>, vector<1x256xf32>
    %119 = vector.shape_cast %118 : vector<1x256xf32> to vector<1x1x256xf32>
    %120 = vector.broadcast %119 : vector<1x1x256xf32> to vector<1x8x256xf32>
    %121 = arith.addf %117, %120 : vector<1x8x256xf32>
    %c0_65 = arith.constant 0 : index
    %c0_66 = arith.constant 0 : index
    %c0_67 = arith.constant 0 : index
    %122 = vector.load %arg5[%c0_65, %c0_66, %c0_67] : memref<1x8x256xf32, #tpu.memory_space<vmem>>, vector<1x8x256xf32>
    tpu.vector_store %arg5[%c0_65, %c0_66, %c0_67], %121 {strides = array<i32>} : memref<1x8x256xf32, #tpu.memory_space<vmem>>, vector<1x8x256xf32>,
    return
  }
  func.func @transform_0(%arg0: i32) -> (i32, i32, i32) {
    %c0_i32 = arith.constant 0 : i32
    %c0_i32_0 = arith.constant 0 : i32
    %c0_i32_1 = arith.constant 0 : i32
    return %arg0, %c0_i32, %c0_i32_0 : i32, i32, i32
  }
  func.func @transform_1(%arg0: i32) -> (i32, i32) {
    %c0_i32 = arith.constant 0 : i32
    %c0_i32_0 = arith.constant 0 : i32
    %c0_i32_1 = arith.constant 0 : i32
    return %c0_i32, %c0_i32_0 : i32, i32
  }
  func.func @transform_2(%arg0: i32) -> (i32, i32, i32) {
    %c0_i32 = arith.constant 0 : i32
    %c0_i32_0 = arith.constant 0 : i32
    %c0_i32_1 = arith.constant 0 : i32
    %c0_i32_2 = arith.constant 0 : i32
    return %c0_i32, %c0_i32_0, %c0_i32_1 : i32, i32, i32
  }
  func.func @transform_3(%arg0: i32) -> (i32, i32) {
    %c0_i32 = arith.constant 0 : i32
    %c0_i32_0 = arith.constant 0 : i32
    %c0_i32_1 = arith.constant 0 : i32
    return %c0_i32, %c0_i32_0 : i32, i32
  }
  func.func @transform_4(%arg0: i32) -> (i32, i32, i32) {
    %c0_i32 = arith.constant 0 : i32
    %c0_i32_0 = arith.constant 0 : i32
    %c0_i32_1 = arith.constant 0 : i32
    return %arg0, %c0_i32, %c0_i32_0 : i32, i32, i32
  }
}

</mosaic_0001>

<bundles_post_ra>
// kernel: multi_head_attention.1
= control target key start
LH: loop header
LB: loop body
LE: loop exit
PB: predicated region body
PF: predicated region fallthrough
CT: control target
= control target key end

     0   :  { %9 = vsyncpa [#allocation4], 0  ;;  %s4210_s0 = inlined_call_operand.vmem [shape: f32[2,8,256], index: 0, kind: input, shape index: {}]   ;;  %s4211_s1 = inlined_call_operand.vmem [shape: f32[256,1536], index: 1, kind: input, shape index: {}]   ;;  %s4212_s2 = inlined_call_operand.vmem [shape: f32[4,128,256], index: 2, kind: input, shape index: {}]   ;;  %s4213_s3 = inlined_call_operand.vmem [shape: f32[1,256], index: 3, kind: input, shape index: {}]   ;;  %s4214_s4 = inlined_call_operand.hbm [shape: f32[2,8,256], index: 4, kind: output, shape index: {}]  }
   0x1   :  { %11 = vsyncpa [#allocation4 + $0x1], 0  ;;  %s2487_s15 = smov 0   ;;  %s2489_s16 = smov 0  }
   0x2   :  { %s2491_s17 = smov 0   ;;  %s2493_s18 = smov 0  }
   0x3 LB: > { %s2508_s19 = sadd.s32 4294967295, %s2456_s18   ;;  %s2166_s20 = sadd.s32 4294967294, %s2456_s18   ;;  %s2456_s18 = sphi %s2493_s18, %s4220_s18   ;;  %s2452_s17 = sphi %s2491_s17, %s4219_s17   ;;  %s2448_s16 = sphi %s2489_s16, %s4218_s16   ;;  %s2444_s15 = sphi %s2487_s15, %s4217_s15  }
   0x4   : > { %s2512_s21 = sadd.s32 1, %s2456_s18   ;;  %s113_s22 = sadd.s32 1, %s2452_s17 }
   0x5   : > { %s110_s23 = ssub.s32 %s2456_s18, %s2512_s21  ;;  %p123_p0 = scmp.ne.s32.totalorder %s2452_s17, %s2448_s16 }
   0x6   : > { %p111_p1 = scmp.eq.s32.totalorder %s110_s23, 0  ;;  %p124_p2 = scmp.eq.s32.totalorder %s2508_s19, 1 }
   0x7   : > { %p129_p3 = scmp.ne.s32.totalorder %s2448_s16, %s2444_s15  ;;  %p130_p4 = scmp.eq.s32.totalorder %s2166_s20, 1 }
   0x8   : > { %s2523_s24 = scalar_select %p111_p1, %s2452_s17, %s113_s22  }
   0x9   : > { %p2525_p5 = por %p124_p2, %p123_p0  ;;  %p2529_p6 = por %p130_p4, %p129_p3 }
   0xa   : > { %p2169_p7 = scmp.ge.s32.totalorder %s2456_s18, 1  ;;  %p165_p8 = scmp.lt.s32.totalorder %s2456_s18, 3 }
   0xc   : > { %p166_p9 = pnand %p2169_p7, %p165_p8 }
   0xd   : > { %p191_p10 = scmp.lt.s32.totalorder (!%p166_p9), %s2508_s19, 1  ;;  %s188_s22 = sand.u32 (!%p166_p9), 1, %s2448_s16  }
   0xe   : > { %169 = sbr.rel (%p166_p9) target bundleno = 1968 (0x7b0), region = 36  ;;  %s2170_s23 = sshll.u32 (!%p166_p9), %s188_s22, 4 }
   0xf   : > { %s2279_s29 = sshll.u32 (!%p166_p9), %s2508_s19, 8  ;;  %s2093_s9 = scalar_lea.sflag (!%p166_p9), [#allocation4], %s188_s22 }
  0x10   : > { %s2105_s8 = scalar_lea.hbm (!%p166_p9), %s4214_s4, %s2279_s29  ;;  %s2461_s11 = smov (!%p166_p9), [#allocation3]  }
  0x13   : > { %v379_v0 = vld [vmem:[%s4211_s1 + $0x5a8] sm:$0xff]  ;;  %v378_v1 = vld [vmem:[%s4211_s1 + $0x5a0] sm:$0xff]  ;;  %s192_s12 = scalar_select %p191_p10, %s2508_s19, 1  ;;  %v381_v47 = vld [vmem:[%s4211_s1 + $0x5b8] sm:$0xff]  ;;  %vm2459_vm0 = vmmov 0   ;;  %vm1086_vm2 = vcmask 64512  }
  0x14   : > { %v367_v2 = vld [vmem:[%s4211_s1 + $0x548] sm:$0xff]  ;;  %582 = vmatprep.subr.mxu0 %v379_v0  ;;  %v366_v3 = vld [vmem:[%s4211_s1 + $0x540] sm:$0xff]  ;;  %v380_v48 = vld [vmem:[%s4211_s1 + $0x5b0] sm:$0xff]  ;;  %653 = vmatprep.subr.mxu1 %v381_v47  ;;  %s2400_s19 = sshll.u32 %s2461_s11, 4  ;;  %s2401_s19 = int_to_ptr.vmem [resolvable:$false] %s2400_s19 }
  0x15   : > { %583 = vmatpush1.msra.mxu0 %v378_v1  ;;  %v355_v4 = vld [vmem:[%s4211_s1 + $0x4e8] sm:$0xff]  ;;  %v354_v5 = vld [vmem:[%s4211_s1 + $0x4e0] sm:$0xff]  ;;  %s2278_s30 = sshll.u32 %s192_s12, 4  ;;  %v369_v50 = vld [vmem:[%s4211_s1 + $0x558] sm:$0xff]  ;;  %654 = vmatpush1.msra.mxu1 %v380_v48 }
  0x16   : > { %584 = vmatprep.subr.mxu0 %v367_v2  ;;  %v343_v6 = vld [vmem:[%s4211_s1 + $0x488] sm:$0xff]  ;;  %v342_v7 = vld [vmem:[%s4211_s1 + $0x480] sm:$0xff]  ;;  %s2603_s14 = scalar_lea.vmem %s4210_s0, %s2278_s30  ;;  %v368_v51 = vld [vmem:[%s4211_s1 + $0x550] sm:$0xff]  ;;  %655 = vmatprep.subr.mxu1 %v369_v50  ;;  %s190_s30 = scalar_lea.vmem [#allocation3], %s2170_s23 }
  0x17   : > { %585 = vmatpush1.msra.mxu0 %v366_v3  ;;  %v331_v8 = vld [vmem:[%s4211_s1 + $0x428] sm:$0xff]  ;;  %v330_v9 = vld [vmem:[%s4211_s1 + $0x420] sm:$0xff]  ;;  %v357_v53 = vld [vmem:[%s4211_s1 + $0x4f8] sm:$0xff]  ;;  %656 = vmatpush1.msra.mxu1 %v368_v51  ;;  %s2107_s5 = sshll.u32 %s190_s30, 4  ;;  %s2108_s5 = int_to_ptr.vmem [resolvable:$true] %s2107_s5 }
  0x18   : > { %586 = vmatprep.subr.mxu0 %v355_v4  ;;  %v319_v10 = vld [vmem:[%s4211_s1 + $0x3c8] sm:$0xff]  ;;  %v318_v11 = vld [vmem:[%s4211_s1 + $0x3c0] sm:$0xff]  ;;  %v356_v55 = vld [vmem:[%s4211_s1 + $0x4f0] sm:$0xff]  ;;  %657 = vmatprep.subr.mxu1 %v357_v53  ;;  %s2396_s10 = scalar_lea.vmem %s2108_s5, 256  ;;  %p2403_p0 = scmp.lt.s32.totalorder %s2108_s5, %s2401_s19 }
  0x19   : > { %587 = vmatpush1.msra.mxu0 %v354_v5  ;;  %v307_v12 = vld [vmem:[%s4211_s1 + $0x368] sm:$0xff]  ;;  %v306_v13 = vld [vmem:[%s4211_s1 + $0x360] sm:$0xff]  ;;  %v345_v57 = vld [vmem:[%s4211_s1 + $0x498] sm:$0xff]  ;;  %658 = vmatpush1.msra.mxu1 %v356_v55  ;;  %p2397_p11 = scmp.ne.s32.totalorder %s2108_s5, %s2396_s10 }
  0x1a   : > { %588 = vmatprep.subr.mxu0 %v343_v6  ;;  %v295_v14 = vld [vmem:[%s4211_s1 + $0x308] sm:$0xff]  ;;  %v294_v15 = vld [vmem:[%s4211_s1 + $0x300] sm:$0xff]  ;;  %v344_v59 = vld [vmem:[%s4211_s1 + $0x490] sm:$0xff]  ;;  %659 = vmatprep.subr.mxu1 %v345_v57 }
  0x1b   : > { %589 = vmatpush1.msra.mxu0 %v342_v7  ;;  %v283_v16 = vld [vmem:[%s4211_s1 + $0x2a8] sm:$0xff]  ;;  %v282_v17 = vld [vmem:[%s4211_s1 + $0x2a0] sm:$0xff]  ;;  %v333_v61 = vld [vmem:[%s4211_s1 + $0x438] sm:$0xff]  ;;  %660 = vmatpush1.msra.mxu1 %v344_v59  ;;  %p2398_p12 = pnand %p2397_p11, %p2525_p5 }
  0x1c   : > { %590 = vmatprep.subr.mxu0 %v331_v8  ;;  %v271_v18 = vld [vmem:[%s4211_s1 + $0x248] sm:$0xff]  ;;  %v270_v19 = vld [vmem:[%s4211_s1 + $0x240] sm:$0xff]  ;;  %v332_v63 = vld [vmem:[%s4211_s1 + $0x430] sm:$0xff]  ;;  %661 = vmatprep.subr.mxu1 %v333_v61 }
  0x1d   : > { %591 = vmatpush1.msra.mxu0 %v330_v9  ;;  %v259_v20 = vld [vmem:[%s4211_s1 + $0x1e8] sm:$0xff]  ;;  %v258_v21 = vld [vmem:[%s4211_s1 + $0x1e0] sm:$0xff]  ;;  %v321_v1 = vld [vmem:[%s4211_s1 + $0x3d8] sm:$0xff]  ;;  %662 = vmatpush1.msra.mxu1 %v332_v63  ;;  %p2399_p13 = pneg %p2398_p12 }
  0x1e   : > { %592 = vmatprep.subr.mxu0 %v319_v10  ;;  %v247_v22 = vld [vmem:[%s4211_s1 + $0x188] sm:$0xff]  ;;  %v246_v23 = vld [vmem:[%s4211_s1 + $0x180] sm:$0xff]  ;;  %v320_v3 = vld [vmem:[%s4211_s1 + $0x3d0] sm:$0xff]  ;;  %663 = vmatprep.subr.mxu1 %v321_v1 }
  0x1f   : > { %593 = vmatpush1.msra.mxu0 %v318_v11  ;;  %v2615_v24 = vld [vmem:[%s2603_s14 + $0x8] sm:$0xff]  ;;  %v234_v26 = vld [vmem:[%s4211_s1 + $0x120] sm:$0xff]  ;;  %v309_v5 = vld [vmem:[%s4211_s1 + $0x378] sm:$0xff]  ;;  %664 = vmatpush1.msra.mxu1 %v320_v3 }
  0x20   : > { %594 = vmatprep.subr.mxu0 %v307_v12  ;;  %v235_v25 = vld [vmem:[%s4211_s1 + $0x128] sm:$0xff]  ;;  %646 = vmatprep.mubr.f32.mxu0 %v2615_v24  ;;  %v222_v28 = vld [vmem:[%s4211_s1 + $0xc0] sm:$0xff]  ;;  %v308_v7 = vld [vmem:[%s4211_s1 + $0x370] sm:$0xff] }
  0x21   : > { %595 = vmatpush1.msra.mxu0 %v306_v13  ;;  %717 = vmatprep.mubr.f32.mxu1 %v2615_v24  ;;  %v223_v27 = vld [vmem:[%s4211_s1 + $0xc8] sm:$0xff]  ;;  %v210_v30 = vld [vmem:[%s4211_s1 + $0x60] sm:$0xff]  ;;  %v297_v9 = vld [vmem:[%s4211_s1 + $0x318] sm:$0xff] }
  0x22   : > { %596 = vmatprep.subr.mxu0 %v295_v14  ;;  %v211_v29 = vld [vmem:[%s4211_s1 + $0x68] sm:$0xff]  ;;  %v198_v32 = vld [vmem:[%s4211_s1] sm:$0xff]  ;;  %665 = vmatprep.subr.mxu1 %v309_v5  ;;  %v296_v11 = vld [vmem:[%s4211_s1 + $0x310] sm:$0xff] }
  0x23   : > { %597 = vmatpush1.msra.mxu0 %v294_v15  ;;  %v199_v31 = vld [vmem:[%s4211_s1 + $0x8] sm:$0xff]  ;;  %v570_v34 = vld [vmem:[%s4211_s1 + $0xba0] sm:$0xff]  ;;  %666 = vmatpush1.msra.mxu1 %v308_v7  ;;  %v285_v13 = vld [vmem:[%s4211_s1 + $0x2b8] sm:$0xff] }
  0x24   : > { %598 = vmatprep.subr.mxu0 %v283_v16  ;;  %v571_v33 = vld [vmem:[%s4211_s1 + $0xba8] sm:$0xff]  ;;  %v558_v36 = vld [vmem:[%s4211_s1 + $0xb40] sm:$0xff]  ;;  %667 = vmatprep.subr.mxu1 %v297_v9  ;;  %v284_v15 = vld [vmem:[%s4211_s1 + $0x2b0] sm:$0xff] }
  0x25   : > { %599 = vmatpush1.msra.mxu0 %v282_v17  ;;  %v559_v35 = vld [vmem:[%s4211_s1 + $0xb48] sm:$0xff]  ;;  %v546_v38 = vld [vmem:[%s4211_s1 + $0xae0] sm:$0xff]  ;;  %668 = vmatpush1.msra.mxu1 %v296_v11  ;;  %v273_v17 = vld [vmem:[%s4211_s1 + $0x258] sm:$0xff] }
  0x26   : > { %600 = vmatprep.subr.mxu0 %v271_v18  ;;  %v547_v37 = vld [vmem:[%s4211_s1 + $0xae8] sm:$0xff]  ;;  %v534_v40 = vld [vmem:[%s4211_s1 + $0xa80] sm:$0xff]  ;;  %669 = vmatprep.subr.mxu1 %v285_v13  ;;  %v200_v47 = vld [vmem:[%s4211_s1 + $0x10] sm:$0xff] }
  0x27   : > { %601 = vmatpush1.msra.mxu0 %v270_v19  ;;  %v535_v39 = vld [vmem:[%s4211_s1 + $0xa88] sm:$0xff]  ;;  %v522_v42 = vld [vmem:[%s4211_s1 + $0xa20] sm:$0xff]  ;;  %v272_v19 = vld [vmem:[%s4211_s1 + $0x250] sm:$0xff]  ;;  %670 = vmatpush1.msra.mxu1 %v284_v15 }
  0x28   : > { %602 = vmatprep.subr.mxu0 %v259_v20  ;;  %v523_v41 = vld [vmem:[%s4211_s1 + $0xa28] sm:$0xff]  ;;  %v510_v44 = vld [vmem:[%s4211_s1 + $0x9c0] sm:$0xff]  ;;  %671 = vmatprep.subr.mxu1 %v273_v17  ;;  %v572_v51 = vld [vmem:[%s4211_s1 + $0xbb0] sm:$0xff] }
  0x29   : > { %603 = vmatpush1.msra.mxu0 %v258_v21  ;;  %v511_v43 = vld [vmem:[%s4211_s1 + $0x9c8] sm:$0xff]  ;;  %v498_v46 = vld [vmem:[%s4211_s1 + $0x960] sm:$0xff]  ;;  %v261_v21 = vld [vmem:[%s4211_s1 + $0x1f8] sm:$0xff]  ;;  %672 = vmatpush1.msra.mxu1 %v272_v19 }
  0x2a   : > { %604 = vmatprep.subr.mxu0 %v247_v22  ;;  %v499_v45 = vld [vmem:[%s4211_s1 + $0x968] sm:$0xff]  ;;  %v486_v52 = vld [vmem:[%s4211_s1 + $0x900] sm:$0xff]  ;;  %673 = vmatprep.subr.mxu1 %v261_v21  ;;  %v561_v53 = vld [vmem:[%s4211_s1 + $0xb58] sm:$0xff] }
  0x2b   : > { %605 = vmatpush1.msra.mxu0 %v246_v23  ;;  %v487_v49 = vld [vmem:[%s4211_s1 + $0x908] sm:$0xff]  ;;  %v474_v56 = vld [vmem:[%s4211_s1 + $0x8a0] sm:$0xff]  ;;  %v560_v55 = vld [vmem:[%s4211_s1 + $0xb50] sm:$0xff] }
  0x2c   : > { %606 = vmatprep.subr.mxu0 %v235_v25  ;;  %v475_v54 = vld [vmem:[%s4211_s1 + $0x8a8] sm:$0xff]  ;;  %v462_v60 = vld [vmem:[%s4211_s1 + $0x840] sm:$0xff]  ;;  %v549_v57 = vld [vmem:[%s4211_s1 + $0xaf8] sm:$0xff] }
  0x2d   : > { %607 = vmatpush1.msra.mxu0 %v234_v26  ;;  %v463_v58 = vld [vmem:[%s4211_s1 + $0x848] sm:$0xff]  ;;  %v450_v0 = vld [vmem:[%s4211_s1 + $0x7e0] sm:$0xff]  ;;  %v548_v59 = vld [vmem:[%s4211_s1 + $0xaf0] sm:$0xff] }
  0x2e   : > { %608 = vmatprep.subr.mxu0 %v223_v27  ;;  %v451_v62 = vld [vmem:[%s4211_s1 + $0x7e8] sm:$0xff]  ;;  %v438_v4 = vld [vmem:[%s4211_s1 + $0x780] sm:$0xff]  ;;  %v260_v27 = vld [vmem:[%s4211_s1 + $0x1f0] sm:$0xff] }
  0x2f   : > { %609 = vmatpush1.msra.mxu0 %v222_v28  ;;  %v439_v2 = vld [vmem:[%s4211_s1 + $0x788] sm:$0xff]  ;;  %v426_v8 = vld [vmem:[%s4211_s1 + $0x720] sm:$0xff]  ;;  %674 = vmatpush1.msra.mxu1 %v260_v27  ;;  %v537_v61 = vld [vmem:[%s4211_s1 + $0xa98] sm:$0xff] }
  0x30   : > { %610 = vmatprep.subr.mxu0 %v211_v29  ;;  %v427_v6 = vld [vmem:[%s4211_s1 + $0x728] sm:$0xff]  ;;  %v414_v12 = vld [vmem:[%s4211_s1 + $0x6c0] sm:$0xff]  ;;  %v249_v29 = vld [vmem:[%s4211_s1 + $0x198] sm:$0xff] }
  0x31   : > { %611 = vmatpush1.msra.mxu0 %v210_v30  ;;  %v415_v10 = vld [vmem:[%s4211_s1 + $0x6c8] sm:$0xff]  ;;  %v402_v16 = vld [vmem:[%s4211_s1 + $0x660] sm:$0xff]  ;;  %675 = vmatprep.subr.mxu1 %v249_v29  ;;  %v536_v63 = vld [vmem:[%s4211_s1 + $0xa90] sm:$0xff] }
  0x32   : > { %612 = vmatprep.subr.mxu0 %v199_v31  ;;  %v403_v14 = vld [vmem:[%s4211_s1 + $0x668] sm:$0xff]  ;;  %v390_v20 = vld [vmem:[%s4211_s1 + $0x600] sm:$0xff]  ;;  %v248_v31 = vld [vmem:[%s4211_s1 + $0x190] sm:$0xff] }
  0x33   : > { %613 = vmatpush1.msra.mxu0 %v198_v32  ;;  %v391_v18 = vld [vmem:[%s4211_s1 + $0x608] sm:$0xff]  ;;  %v2803_v22 = vld [vmem:[%s2603_s14] sm:$0xff]  ;;  %676 = vmatpush1.msra.mxu1 %v248_v31  ;;  %v525_v1 = vld [vmem:[%s4211_s1 + $0xa38] sm:$0xff] }
  0x34   : > { %614 = vmatprep.subr.mxu0 %v571_v33  ;;  %v383_v23 = vld [vmem:[%s4211_s1 + $0x5c8] sm:$0xff]  ;;  %v382_v25 = vld [vmem:[%s4211_s1 + $0x5c0] sm:$0xff]  ;;  %v237_v33 = vld [vmem:[%s4211_s1 + $0x138] sm:$0xff] }
  0x35   : > { %615 = vmatpush2.msra.mxu0 %v570_v34  ;;  %v371_v26 = vld [vmem:[%s4211_s1 + $0x568] sm:$0xff]  ;;  %v370_v28 = vld [vmem:[%s4211_s1 + $0x560] sm:$0xff]  ;;  %677 = vmatprep.subr.mxu1 %v237_v33  ;;  %v524_v3 = vld [vmem:[%s4211_s1 + $0xa30] sm:$0xff] }
  0x36   : > { %616 = vmatprep.subr.mxu0 %v559_v35  ;;  %v359_v30 = vld [vmem:[%s4211_s1 + $0x508] sm:$0xff]  ;;  %v358_v32 = vld [vmem:[%s4211_s1 + $0x500] sm:$0xff]  ;;  %v236_v35 = vld [vmem:[%s4211_s1 + $0x130] sm:$0xff] }
  0x37   : > { %617 = vmatpush2.msra.mxu0 %v558_v36  ;;  %v347_v34 = vld [vmem:[%s4211_s1 + $0x4a8] sm:$0xff]  ;;  %v346_v36 = vld [vmem:[%s4211_s1 + $0x4a0] sm:$0xff]  ;;  %678 = vmatpush1.msra.mxu1 %v236_v35  ;;  %v513_v5 = vld [vmem:[%s4211_s1 + $0x9d8] sm:$0xff] }
  0x38   : > { %618 = vmatprep.subr.mxu0 %v547_v37  ;;  %v225_v37 = vld [vmem:[%s4211_s1 + $0xd8] sm:$0xff]  ;;  %v310_v48 = vld [vmem:[%s4211_s1 + $0x380] sm:$0xff]  ;;  %v299_v50 = vld [vmem:[%s4211_s1 + $0x328] sm:$0xff] }
  0x39   : > { %619 = vmatpush2.msra.mxu0 %v546_v38  ;;  %v335_v38 = vld [vmem:[%s4211_s1 + $0x448] sm:$0xff]  ;;  %679 = vmatprep.subr.mxu1 %v225_v37  ;;  %v512_v7 = vld [vmem:[%s4211_s1 + $0x9d0] sm:$0xff]  ;;  %v501_v9 = vld [vmem:[%s4211_s1 + $0x978] sm:$0xff] }
  0x3a   : > { %620 = vmatprep.subr.mxu0 %v535_v39  ;;  %v224_v39 = vld [vmem:[%s4211_s1 + $0xd0] sm:$0xff]  ;;  %v489_v13 = vld [vmem:[%s4211_s1 + $0x918] sm:$0xff] }
  0x3b   : > { %621 = vmatpush2.msra.mxu0 %v534_v40  ;;  %v334_v40 = vld [vmem:[%s4211_s1 + $0x440] sm:$0xff]  ;;  %680 = vmatpush1.msra.mxu1 %v224_v39  ;;  %v500_v11 = vld [vmem:[%s4211_s1 + $0x970] sm:$0xff]  ;;  %v477_v17 = vld [vmem:[%s4211_s1 + $0x8b8] sm:$0xff] }
  0x3c   : > { %622 = vmatprep.subr.mxu0 %v523_v41  ;;  %v213_v41 = vld [vmem:[%s4211_s1 + $0x78] sm:$0xff]  ;;  %v488_v15 = vld [vmem:[%s4211_s1 + $0x910] sm:$0xff] }
  0x3d   : > { %623 = vmatpush2.msra.mxu0 %v522_v42  ;;  %v323_v42 = vld [vmem:[%s4211_s1 + $0x3e8] sm:$0xff]  ;;  %681 = vmatprep.subr.mxu1 %v213_v41  ;;  %v476_v19 = vld [vmem:[%s4211_s1 + $0x8b0] sm:$0xff]  ;;  %v465_v21 = vld [vmem:[%s4211_s1 + $0x858] sm:$0xff] }
  0x3e   : > { %624 = vmatprep.subr.mxu0 %v511_v43  ;;  %v212_v43 = vld [vmem:[%s4211_s1 + $0x70] sm:$0xff]  ;;  %v453_v27 = vld [vmem:[%s4211_s1 + $0x7f8] sm:$0xff] }
  0x3f   : > { %625 = vmatpush2.msra.mxu0 %v510_v44  ;;  %v322_v44 = vld [vmem:[%s4211_s1 + $0x3e0] sm:$0xff]  ;;  %682 = vmatpush1.msra.mxu1 %v212_v43  ;;  %v452_v29 = vld [vmem:[%s4211_s1 + $0x7f0] sm:$0xff]  ;;  %v441_v31 = vld [vmem:[%s4211_s1 + $0x798] sm:$0xff] }
  0x40   : > { %626 = vmatprep.subr.mxu0 %v499_v45  ;;  %v201_v45 = vld [vmem:[%s4211_s1 + $0x18] sm:$0xff]  ;;  %v440_v33 = vld [vmem:[%s4211_s1 + $0x790] sm:$0xff] }
  0x41   : > { %627 = vmatpush2.msra.mxu0 %v498_v46  ;;  %v311_v46 = vld [vmem:[%s4211_s1 + $0x388] sm:$0xff]  ;;  %683 = vmatprep.subr.mxu1 %v201_v45  ;;  %v429_v35 = vld [vmem:[%s4211_s1 + $0x738] sm:$0xff]  ;;  %v428_v37 = vld [vmem:[%s4211_s1 + $0x730] sm:$0xff] }
  0x42   : > { %628 = vmatprep.subr.mxu0 %v487_v49  ;;  %v573_v49 = vld [vmem:[%s4211_s1 + $0xbb8] sm:$0xff]  ;;  %684 = vmatpush1.msra.mxu1 %v200_v47  ;;  %v416_v41 = vld [vmem:[%s4211_s1 + $0x6d0] sm:$0xff] }
  0x43   : > { %629 = vmatpush2.msra.mxu0 %v486_v52  ;;  %v298_v52 = vld [vmem:[%s4211_s1 + $0x320] sm:$0xff]  ;;  %685 = vmatprep.subr.mxu1 %v573_v49  ;;  %v417_v39 = vld [vmem:[%s4211_s1 + $0x6d8] sm:$0xff]  ;;  %v404_v45 = vld [vmem:[%s4211_s1 + $0x670] sm:$0xff] }
  0x44   : > { %630 = vmatprep.subr.mxu0 %v475_v54  ;;  %v287_v54 = vld [vmem:[%s4211_s1 + $0x2c8] sm:$0xff]  ;;  %686 = vmatpush2.msra.mxu1 %v572_v51  ;;  %v405_v43 = vld [vmem:[%s4211_s1 + $0x678] sm:$0xff]  ;;  %v392_v49 = vld [vmem:[%s4211_s1 + $0x610] sm:$0xff] }
  0x45   : > { %631 = vmatpush2.msra.mxu0 %v474_v56  ;;  %v286_v56 = vld [vmem:[%s4211_s1 + $0x2c0] sm:$0xff]  ;;  %687 = vmatprep.subr.mxu1 %v561_v53  ;;  %v393_v47 = vld [vmem:[%s4211_s1 + $0x618] sm:$0xff] }
  0x46   : > { %632 = vmatprep.subr.mxu0 %v463_v58  ;;  %v275_v58 = vld [vmem:[%s4211_s1 + $0x268] sm:$0xff]  ;;  %688 = vmatpush2.msra.mxu1 %v560_v55  ;;  %v385_v51 = vld [vmem:[%s4211_s1 + $0x5d8] sm:$0xff]  ;;  %v490_v53 = vld [vmem:[%s4211_s1 + $0x920] sm:$0xff] }
  0x47   : > { %633 = vmatpush2.msra.mxu0 %v462_v60  ;;  %v274_v60 = vld [vmem:[%s4211_s1 + $0x260] sm:$0xff]  ;;  %689 = vmatprep.subr.mxu1 %v549_v57  ;;  %v479_v55 = vld [vmem:[%s4211_s1 + $0x8c8] sm:$0xff] }
  0x48   : > { %634 = vmatprep.subr.mxu0 %v451_v62  ;;  %v263_v62 = vld [vmem:[%s4211_s1 + $0x208] sm:$0xff]  ;;  %690 = vmatpush2.msra.mxu1 %v548_v59  ;;  %v478_v57 = vld [vmem:[%s4211_s1 + $0x8c0] sm:$0xff] }
  0x49   : > { %635 = vmatpush2.msra.mxu0 %v450_v0  ;;  %v262_v0 = vld [vmem:[%s4211_s1 + $0x200] sm:$0xff]  ;;  %691 = vmatprep.subr.mxu1 %v537_v61  ;;  %v467_v59 = vld [vmem:[%s4211_s1 + $0x868] sm:$0xff] }
  0x4a   : > { %636 = vmatprep.subr.mxu0 %v439_v2  ;;  %v251_v2 = vld [vmem:[%s4211_s1 + $0x1a8] sm:$0xff]  ;;  %692 = vmatpush2.msra.mxu1 %v536_v63  ;;  %v466_v61 = vld [vmem:[%s4211_s1 + $0x860] sm:$0xff] }
  0x4b   : > { %637 = vmatpush2.msra.mxu0 %v438_v4  ;;  %v250_v4 = vld [vmem:[%s4211_s1 + $0x1a0] sm:$0xff]  ;;  %693 = vmatprep.subr.mxu1 %v525_v1  ;;  %v455_v63 = vld [vmem:[%s4211_s1 + $0x808] sm:$0xff] }
  0x4c   : > { %638 = vmatprep.subr.mxu0 %v427_v6  ;;  %v239_v6 = vld [vmem:[%s4211_s1 + $0x148] sm:$0xff]  ;;  %694 = vmatpush2.msra.mxu1 %v524_v3  ;;  %v454_v1 = vld [vmem:[%s4211_s1 + $0x800] sm:$0xff] }
  0x4d   : > { %639 = vmatpush2.msra.mxu0 %v426_v8  ;;  %v238_v8 = vld [vmem:[%s4211_s1 + $0x140] sm:$0xff]  ;;  %695 = vmatprep.subr.mxu1 %v513_v5  ;;  %v443_v3 = vld [vmem:[%s4211_s1 + $0x7a8] sm:$0xff] }
  0x4e   : > { %640 = vmatprep.subr.mxu0 %v415_v10  ;;  %v227_v10 = vld [vmem:[%s4211_s1 + $0xe8] sm:$0xff]  ;;  %696 = vmatpush2.msra.mxu1 %v512_v7  ;;  %v442_v5 = vld [vmem:[%s4211_s1 + $0x7a0] sm:$0xff] }
  0x4f   : > { %641 = vmatpush2.msra.mxu0 %v414_v12  ;;  %v226_v12 = vld [vmem:[%s4211_s1 + $0xe0] sm:$0xff]  ;;  %697 = vmatprep.subr.mxu1 %v501_v9  ;;  %v431_v7 = vld [vmem:[%s4211_s1 + $0x748] sm:$0xff] }
  0x50   : > { %642 = vmatprep.subr.mxu0 %v403_v14  ;;  %v215_v14 = vld [vmem:[%s4211_s1 + $0x88] sm:$0xff]  ;;  %698 = vmatpush2.msra.mxu1 %v500_v11  ;;  %v430_v9 = vld [vmem:[%s4211_s1 + $0x740] sm:$0xff] }
  0x51   : > { %643 = vmatpush2.msra.mxu0 %v402_v16  ;;  %v214_v16 = vld [vmem:[%s4211_s1 + $0x80] sm:$0xff]  ;;  %699 = vmatprep.subr.mxu1 %v489_v13  ;;  %v419_v11 = vld [vmem:[%s4211_s1 + $0x6e8] sm:$0xff] }
  0x52   : > { %644 = vmatprep.subr.mxu0 %v391_v18  ;;  %v203_v18 = vld [vmem:[%s4211_s1 + $0x28] sm:$0xff]  ;;  %700 = vmatpush2.msra.mxu1 %v488_v15  ;;  %v418_v13 = vld [vmem:[%s4211_s1 + $0x6e0] sm:$0xff] }
  0x53   : > { %645 = vmatpush2.msra.mxu0 %v390_v20  ;;  %v202_v20 = vld [vmem:[%s4211_s1 + $0x20] sm:$0xff]  ;;  %701 = vmatprep.subr.mxu1 %v477_v17  ;;  %v407_v15 = vld [vmem:[%s4211_s1 + $0x688] sm:$0xff] }
  0x54   : > { %647 = vmatmul.mubr.f32.vlgmr.msra.gmra.mxu0 %v2803_v22  ;;  %724 = vmatprep.subr.mxu0 %v383_v23  ;;  %v575_v23 = vld [vmem:[%s4211_s1 + $0xbc8] sm:$0xff]  ;;  %v406_v17 = vld [vmem:[%s4211_s1 + $0x680] sm:$0xff] }
  0x55   : > { %725 = vmatpush1.msra.mxu0 %v382_v25  ;;  %788 = vmatprep.mubr.f32.mxu0 %v2615_v24  ;;  %v464_v25 = vld [vmem:[%s4211_s1 + $0x850] sm:$0xff] }
  0x56   : > { %726 = vmatprep.subr.mxu0 %v371_v26  ;;  %v574_v26 = vld [vmem:[%s4211_s1 + $0xbc0] sm:$0xff]  ;;  %702 = vmatpush2.msra.mxu1 %v476_v19  ;;  %v395_v19 = vld [vmem:[%s4211_s1 + $0x628] sm:$0xff] }
  0x57   : > { %727 = vmatpush1.msra.mxu0 %v370_v28  ;;  %v563_v28 = vld [vmem:[%s4211_s1 + $0xb68] sm:$0xff]  ;;  %703 = vmatprep.subr.mxu1 %v465_v21  ;;  %v394_v21 = vld [vmem:[%s4211_s1 + $0x620] sm:$0xff] }
  0x58   : > { %728 = vmatprep.subr.mxu0 %v359_v30  ;;  %v562_v30 = vld [vmem:[%s4211_s1 + $0xb60] sm:$0xff]  ;;  %704 = vmatpush2.msra.mxu1 %v464_v25  ;;  %v277_v25 = vld [vmem:[%s4211_s1 + $0x278] sm:$0xff] }
  0x59   : > { %729 = vmatpush1.msra.mxu0 %v358_v32  ;;  %v551_v32 = vld [vmem:[%s4211_s1 + $0xb08] sm:$0xff]  ;;  %705 = vmatprep.subr.mxu1 %v453_v27 }
  0x5a   : > { %730 = vmatprep.subr.mxu0 %v347_v34  ;;  %v550_v34 = vld [vmem:[%s4211_s1 + $0xb00] sm:$0xff]  ;;  %706 = vmatpush2.msra.mxu1 %v452_v29  ;;  %v387_v27 = vld [vmem:[%s4211_s1 + $0x5e8] sm:$0xff] }
  0x5b   : > { %731 = vmatpush1.msra.mxu0 %v346_v36  ;;  %v539_v36 = vld [vmem:[%s4211_s1 + $0xaa8] sm:$0xff]  ;;  %707 = vmatprep.subr.mxu1 %v441_v31  ;;  %v386_v29 = vld [vmem:[%s4211_s1 + $0x5e0] sm:$0xff] }
  0x5c   : > { %732 = vmatprep.subr.mxu0 %v335_v38  ;;  %v538_v38 = vld [vmem:[%s4211_s1 + $0xaa0] sm:$0xff]  ;;  %708 = vmatpush2.msra.mxu1 %v440_v33  ;;  %v375_v31 = vld [vmem:[%s4211_s1 + $0x588] sm:$0xff]  ;;  %v252_v33 = vld [vmem:[%s4211_s1 + $0x1b0] sm:$0xff] }
  0x5d   : > { %733 = vmatpush1.msra.mxu0 %v334_v40  ;;  %v527_v40 = vld [vmem:[%s4211_s1 + $0xa48] sm:$0xff]  ;;  %709 = vmatprep.subr.mxu1 %v429_v35  ;;  %v241_v35 = vld [vmem:[%s4211_s1 + $0x158] sm:$0xff] }
  0x5e   : > { %734 = vmatprep.subr.mxu0 %v323_v42  ;;  %v526_v42 = vld [vmem:[%s4211_s1 + $0xa40] sm:$0xff]  ;;  %710 = vmatpush2.msra.mxu1 %v428_v37  ;;  %v240_v37 = vld [vmem:[%s4211_s1 + $0x150] sm:$0xff] }
  0x5f   : > { %735 = vmatpush1.msra.mxu0 %v322_v44  ;;  %v515_v44 = vld [vmem:[%s4211_s1 + $0x9e8] sm:$0xff]  ;;  %711 = vmatprep.subr.mxu1 %v417_v39  ;;  %v229_v39 = vld [vmem:[%s4211_s1 + $0xf8] sm:$0xff] }
  0x60   : > { %736 = vmatprep.subr.mxu0 %v311_v46  ;;  %v514_v46 = vld [vmem:[%s4211_s1 + $0x9e0] sm:$0xff]  ;;  %712 = vmatpush2.msra.mxu1 %v416_v41  ;;  %v228_v41 = vld [vmem:[%s4211_s1 + $0xf0] sm:$0xff] }
  0x61   : > { %737 = vmatpush1.msra.mxu0 %v310_v48  ;;  %v503_v48 = vld [vmem:[%s4211_s1 + $0x988] sm:$0xff]  ;;  %713 = vmatprep.subr.mxu1 %v405_v43 }
  0x62   : > { %738 = vmatprep.subr.mxu0 %v299_v50  ;;  %v502_v50 = vld [vmem:[%s4211_s1 + $0x980] sm:$0xff]  ;;  %714 = vmatpush2.msra.mxu1 %v404_v45  ;;  %v339_v43 = vld [vmem:[%s4211_s1 + $0x468] sm:$0xff] }
  0x63   : > { %739 = vmatpush1.msra.mxu0 %v298_v52  ;;  %v491_v52 = vld [vmem:[%s4211_s1 + $0x928] sm:$0xff]  ;;  %715 = vmatprep.subr.mxu1 %v393_v47  ;;  %v338_v45 = vld [vmem:[%s4211_s1 + $0x460] sm:$0xff] }
  0x64   : > { %740 = vmatprep.subr.mxu0 %v287_v54  ;;  %716 = vmatpush2.msra.mxu1 %v392_v49  ;;  %v384_v54 = vld [vmem:[%s4211_s1 + $0x5d0] sm:$0xff]  ;;  %v327_v47 = vld [vmem:[%s4211_s1 + $0x408] sm:$0xff]  ;;  %v326_v49 = vld [vmem:[%s4211_s1 + $0x400] sm:$0xff] }
  0x65   : > { %741 = vmatpush1.msra.mxu0 %v286_v56  ;;  %795 = vmatprep.subr.mxu1 %v385_v51  ;;  %v373_v56 = vld [vmem:[%s4211_s1 + $0x578] sm:$0xff]  ;;  %v315_v51 = vld [vmem:[%s4211_s1 + $0x3a8] sm:$0xff] }
  0x66   : > { %742 = vmatprep.subr.mxu0 %v275_v58  ;;  %718 = vmatmul.mubr.f32.vlgmr.msra.gmra.mxu1 %v2803_v22  ;;  %v372_v58 = vld [vmem:[%s4211_s1 + $0x570] sm:$0xff] }
  0x67   : > { %743 = vmatpush1.msra.mxu0 %v274_v60  ;;  %796 = vmatpush1.msra.mxu1 %v384_v54  ;;  %v361_v60 = vld [vmem:[%s4211_s1 + $0x518] sm:$0xff] }
  0x68   : > { %744 = vmatprep.subr.mxu0 %v263_v62  ;;  %797 = vmatprep.subr.mxu1 %v373_v56  ;;  %v360_v62 = vld [vmem:[%s4211_s1 + $0x510] sm:$0xff]  ;;  %v565_v54 = vld [vmem:[%s4211_s1 + $0xb78] sm:$0xff] }
  0x69   : > { %745 = vmatpush1.msra.mxu0 %v262_v0  ;;  %798 = vmatpush1.msra.mxu1 %v372_v58  ;;  %v349_v0 = vld [vmem:[%s4211_s1 + $0x4b8] sm:$0xff]  ;;  %v564_v56 = vld [vmem:[%s4211_s1 + $0xb70] sm:$0xff] }
  0x6a   : > { %746 = vmatprep.subr.mxu0 %v251_v2  ;;  %799 = vmatprep.subr.mxu1 %v361_v60  ;;  %v348_v2 = vld [vmem:[%s4211_s1 + $0x4b0] sm:$0xff]  ;;  %v553_v58 = vld [vmem:[%s4211_s1 + $0xb18] sm:$0xff] }
  0x6b   : > { %747 = vmatpush1.msra.mxu0 %v250_v4  ;;  %800 = vmatpush1.msra.mxu1 %v360_v62  ;;  %v337_v4 = vld [vmem:[%s4211_s1 + $0x458] sm:$0xff]  ;;  %v552_v60 = vld [vmem:[%s4211_s1 + $0xb10] sm:$0xff] }
  0x6c   : > { %748 = vmatprep.subr.mxu0 %v239_v6  ;;  %801 = vmatprep.subr.mxu1 %v349_v0  ;;  %v336_v6 = vld [vmem:[%s4211_s1 + $0x450] sm:$0xff]  ;;  %v541_v62 = vld [vmem:[%s4211_s1 + $0xab8] sm:$0xff] }
  0x6d   : > { %749 = vmatpush1.msra.mxu0 %v238_v8  ;;  %802 = vmatpush1.msra.mxu1 %v348_v2  ;;  %v325_v8 = vld [vmem:[%s4211_s1 + $0x3f8] sm:$0xff]  ;;  %v540_v0 = vld [vmem:[%s4211_s1 + $0xab0] sm:$0xff] }
  0x6e   : > { %750 = vmatprep.subr.mxu0 %v227_v10  ;;  %803 = vmatprep.subr.mxu1 %v337_v4  ;;  %v324_v10 = vld [vmem:[%s4211_s1 + $0x3f0] sm:$0xff]  ;;  %v529_v2 = vld [vmem:[%s4211_s1 + $0xa58] sm:$0xff] }
  0x6f   : > { %751 = vmatpush1.msra.mxu0 %v226_v12  ;;  %804 = vmatpush1.msra.mxu1 %v336_v6  ;;  %v313_v12 = vld [vmem:[%s4211_s1 + $0x398] sm:$0xff]  ;;  %v528_v4 = vld [vmem:[%s4211_s1 + $0xa50] sm:$0xff] }
  0x70   : > { %752 = vmatprep.subr.mxu0 %v215_v14  ;;  %805 = vmatprep.subr.mxu1 %v325_v8  ;;  %v312_v14 = vld [vmem:[%s4211_s1 + $0x390] sm:$0xff]  ;;  %v517_v6 = vld [vmem:[%s4211_s1 + $0x9f8] sm:$0xff] }
  0x71   : > { %753 = vmatpush1.msra.mxu0 %v214_v16  ;;  %806 = vmatpush1.msra.mxu1 %v324_v10  ;;  %v301_v16 = vld [vmem:[%s4211_s1 + $0x338] sm:$0xff]  ;;  %v516_v8 = vld [vmem:[%s4211_s1 + $0x9f0] sm:$0xff] }
  0x72   : > { %754 = vmatprep.subr.mxu0 %v203_v18  ;;  %807 = vmatprep.subr.mxu1 %v313_v12  ;;  %v300_v18 = vld [vmem:[%s4211_s1 + $0x330] sm:$0xff]  ;;  %v505_v10 = vld [vmem:[%s4211_s1 + $0x998] sm:$0xff] }
  0x73   : > { %755 = vmatpush1.msra.mxu0 %v202_v20  ;;  %808 = vmatpush1.msra.mxu1 %v312_v14  ;;  %v289_v20 = vld [vmem:[%s4211_s1 + $0x2d8] sm:$0xff]  ;;  %v504_v12 = vld [vmem:[%s4211_s1 + $0x990] sm:$0xff] }
  0x74   : > { %756 = vmatprep.subr.mxu0 %v575_v23  ;;  %809 = vmatprep.subr.mxu1 %v301_v16  ;;  %v288_v23 = vld [vmem:[%s4211_s1 + $0x2d0] sm:$0xff]  ;;  %v493_v14 = vld [vmem:[%s4211_s1 + $0x938] sm:$0xff] }
  0x75   : > { %757 = vmatpush2.msra.mxu0 %v574_v26  ;;  %810 = vmatpush1.msra.mxu1 %v300_v18  ;;  %v276_v26 = vld [vmem:[%s4211_s1 + $0x270] sm:$0xff]  ;;  %v481_v18 = vld [vmem:[%s4211_s1 + $0x8d8] sm:$0xff] }
  0x76   : > { %758 = vmatprep.subr.mxu0 %v563_v28  ;;  %811 = vmatprep.subr.mxu1 %v289_v20  ;;  %v265_v28 = vld [vmem:[%s4211_s1 + $0x218] sm:$0xff]  ;;  %v492_v16 = vld [vmem:[%s4211_s1 + $0x930] sm:$0xff] }
  0x77   : > { %759 = vmatpush2.msra.mxu0 %v562_v30  ;;  %812 = vmatpush1.msra.mxu1 %v288_v23  ;;  %v264_v30 = vld [vmem:[%s4211_s1 + $0x210] sm:$0xff]  ;;  %v469_v23 = vld [vmem:[%s4211_s1 + $0x878] sm:$0xff] }
  0x78   : > { %760 = vmatprep.subr.mxu0 %v551_v32  ;;  %813 = vmatprep.subr.mxu1 %v277_v25  ;;  %v253_v32 = vld [vmem:[%s4211_s1 + $0x1b8] sm:$0xff]  ;;  %v480_v20 = vld [vmem:[%s4211_s1 + $0x8d0] sm:$0xff]  ;;  %v207_v25 = vld [vmem:[%s4211_s1 + $0x48] sm:$0xff] }
  0x79   : > { %761 = vmatpush2.msra.mxu0 %v550_v34  ;;  %814 = vmatpush1.msra.mxu1 %v276_v26  ;;  %v374_v34 = vld [vmem:[%s4211_s1 + $0x580] sm:$0xff]  ;;  %v468_v26 = vld [vmem:[%s4211_s1 + $0x870] sm:$0xff] }
  0x7a   : > { %762 = vmatprep.subr.mxu0 %v539_v36  ;;  %815 = vmatprep.subr.mxu1 %v265_v28  ;;  %v363_v36 = vld [vmem:[%s4211_s1 + $0x528] sm:$0xff]  ;;  %v457_v28 = vld [vmem:[%s4211_s1 + $0x818] sm:$0xff] }
  0x7b   : > { %763 = vmatpush2.msra.mxu0 %v538_v38  ;;  %816 = vmatpush1.msra.mxu1 %v264_v30  ;;  %v362_v38 = vld [vmem:[%s4211_s1 + $0x520] sm:$0xff]  ;;  %v456_v30 = vld [vmem:[%s4211_s1 + $0x810] sm:$0xff] }
  0x7c   : > { %764 = vmatprep.subr.mxu0 %v527_v40  ;;  %817 = vmatprep.subr.mxu1 %v253_v32  ;;  %v351_v40 = vld [vmem:[%s4211_s1 + $0x4c8] sm:$0xff]  ;;  %v445_v32 = vld [vmem:[%s4211_s1 + $0x7b8] sm:$0xff] }
  0x7d   : > { %765 = vmatpush2.msra.mxu0 %v526_v42  ;;  %859 = vmatprep.mubr.f32.mxu1 %v2615_v24  ;;  %v350_v24 = vld [vmem:[%s4211_s1 + $0x4c0] sm:$0xff]  ;;  %v217_v42 = vld [vmem:[%s4211_s1 + $0x98] sm:$0xff] }
  0x7e   : > { %766 = vmatprep.subr.mxu0 %v515_v44  ;;  %818 = vmatpush1.msra.mxu1 %v252_v33  ;;  %v216_v44 = vld [vmem:[%s4211_s1 + $0x90] sm:$0xff]  ;;  %v567_v33 = vld [vmem:[%s4211_s1 + $0xb88] sm:$0xff] }
  0x7f   : > { %767 = vmatpush2.msra.mxu0 %v514_v46  ;;  %819 = vmatprep.subr.mxu1 %v241_v35  ;;  %v205_v46 = vld [vmem:[%s4211_s1 + $0x38] sm:$0xff]  ;;  %v566_v35 = vld [vmem:[%s4211_s1 + $0xb80] sm:$0xff] }
  0x80   : > { %768 = vmatprep.subr.mxu0 %v503_v48  ;;  %820 = vmatpush1.msra.mxu1 %v240_v37  ;;  %v204_v48 = vld [vmem:[%s4211_s1 + $0x30] sm:$0xff]  ;;  %v555_v37 = vld [vmem:[%s4211_s1 + $0xb28] sm:$0xff] }
  0x81   : > { %769 = vmatpush2.msra.mxu0 %v502_v50  ;;  %821 = vmatprep.subr.mxu1 %v229_v39  ;;  %v577_v50 = vld [vmem:[%s4211_s1 + $0xbd8] sm:$0xff]  ;;  %v554_v39 = vld [vmem:[%s4211_s1 + $0xb20] sm:$0xff] }
  0x82   : > { %770 = vmatprep.subr.mxu0 %v491_v52  ;;  %822 = vmatpush1.msra.mxu1 %v228_v41  ;;  %v576_v52 = vld [vmem:[%s4211_s1 + $0xbd0] sm:$0xff]  ;;  %v543_v41 = vld [vmem:[%s4211_s1 + $0xac8] sm:$0xff] }
  0x83   : > { %771 = vmatpush2.msra.mxu0 %v490_v53  ;;  %823 = vmatprep.subr.mxu1 %v217_v42  ;;  %v314_v53 = vld [vmem:[%s4211_s1 + $0x3a0] sm:$0xff] }
  0x84   : > { %772 = vmatprep.subr.mxu0 %v479_v55  ;;  %824 = vmatpush1.msra.mxu1 %v216_v44  ;;  %v303_v55 = vld [vmem:[%s4211_s1 + $0x348] sm:$0xff]  ;;  %v542_v42 = vld [vmem:[%s4211_s1 + $0xac0] sm:$0xff] }
  0x85   : > { %773 = vmatpush2.msra.mxu0 %v478_v57  ;;  %825 = vmatprep.subr.mxu1 %v205_v46  ;;  %v302_v57 = vld [vmem:[%s4211_s1 + $0x340] sm:$0xff]  ;;  %v531_v44 = vld [vmem:[%s4211_s1 + $0xa68] sm:$0xff] }
  0x86   : > { %774 = vmatprep.subr.mxu0 %v467_v59  ;;  %826 = vmatpush1.msra.mxu1 %v204_v48  ;;  %v291_v59 = vld [vmem:[%s4211_s1 + $0x2e8] sm:$0xff]  ;;  %v530_v46 = vld [vmem:[%s4211_s1 + $0xa60] sm:$0xff] }
  0x87   : > { %775 = vmatpush2.msra.mxu0 %v466_v61  ;;  %827 = vmatprep.subr.mxu1 %v577_v50  ;;  %v290_v61 = vld [vmem:[%s4211_s1 + $0x2e0] sm:$0xff]  ;;  %v519_v48 = vld [vmem:[%s4211_s1 + $0xa08] sm:$0xff] }
  0x88   : > { %776 = vmatprep.subr.mxu0 %v455_v63  ;;  %828 = vmatpush2.msra.mxu1 %v576_v52  ;;  %v279_v63 = vld [vmem:[%s4211_s1 + $0x288] sm:$0xff]  ;;  %v518_v50 = vld [vmem:[%s4211_s1 + $0xa00] sm:$0xff]  ;;  %v388_v52 = vld [vmem:[%s4211_s1 + $0x5f0] sm:$0xff] }
  0x89   : > { %777 = vmatpush2.msra.mxu0 %v454_v1  ;;  %829 = vmatprep.subr.mxu1 %v565_v54  ;;  %v278_v1 = vld [vmem:[%s4211_s1 + $0x280] sm:$0xff]  ;;  %v377_v54 = vld [vmem:[%s4211_s1 + $0x598] sm:$0xff] }
  0x8a   : > { %778 = vmatprep.subr.mxu0 %v443_v3  ;;  %830 = vmatpush2.msra.mxu1 %v564_v56  ;;  %v267_v3 = vld [vmem:[%s4211_s1 + $0x228] sm:$0xff]  ;;  %v376_v56 = vld [vmem:[%s4211_s1 + $0x590] sm:$0xff] }
  0x8b   : > { %779 = vmatpush2.msra.mxu0 %v442_v5  ;;  %831 = vmatprep.subr.mxu1 %v553_v58  ;;  %v266_v5 = vld [vmem:[%s4211_s1 + $0x220] sm:$0xff]  ;;  %v365_v58 = vld [vmem:[%s4211_s1 + $0x538] sm:$0xff] }
  0x8c   : > { %780 = vmatprep.subr.mxu0 %v431_v7  ;;  %832 = vmatpush2.msra.mxu1 %v552_v60  ;;  %v255_v7 = vld [vmem:[%s4211_s1 + $0x1c8] sm:$0xff] }
  0x8d   : > { %781 = vmatpush2.msra.mxu0 %v430_v9  ;;  %833 = vmatprep.subr.mxu1 %v541_v62  ;;  %v254_v9 = vld [vmem:[%s4211_s1 + $0x1c0] sm:$0xff]  ;;  %v483_v60 = vld [vmem:[%s4211_s1 + $0x8e8] sm:$0xff] }
  0x8e   : > { %782 = vmatprep.subr.mxu0 %v419_v11  ;;  %834 = vmatpush2.msra.mxu1 %v540_v0  ;;  %v243_v11 = vld [vmem:[%s4211_s1 + $0x168] sm:$0xff]  ;;  %v482_v62 = vld [vmem:[%s4211_s1 + $0x8e0] sm:$0xff] }
  0x8f   : > { %783 = vmatpush2.msra.mxu0 %v418_v13  ;;  %835 = vmatprep.subr.mxu1 %v529_v2  ;;  %v242_v13 = vld [vmem:[%s4211_s1 + $0x160] sm:$0xff]  ;;  %v471_v0 = vld [vmem:[%s4211_s1 + $0x888] sm:$0xff] }
  0x90   : > { %784 = vmatprep.subr.mxu0 %v407_v15  ;;  %836 = vmatpush2.msra.mxu1 %v528_v4  ;;  %v231_v15 = vld [vmem:[%s4211_s1 + $0x108] sm:$0xff]  ;;  %v470_v2 = vld [vmem:[%s4211_s1 + $0x880] sm:$0xff] }
  0x91   : > { %785 = vmatpush2.msra.mxu0 %v406_v17  ;;  %837 = vmatprep.subr.mxu1 %v517_v6  ;;  %v230_v17 = vld [vmem:[%s4211_s1 + $0x100] sm:$0xff]  ;;  %v459_v4 = vld [vmem:[%s4211_s1 + $0x828] sm:$0xff] }
  0x92   : > { %786 = vmatprep.subr.mxu0 %v395_v19  ;;  %838 = vmatpush2.msra.mxu1 %v516_v8  ;;  %v219_v19 = vld [vmem:[%s4211_s1 + $0xa8] sm:$0xff]  ;;  %v458_v6 = vld [vmem:[%s4211_s1 + $0x820] sm:$0xff] }
  0x93   : > { %787 = vmatpush2.msra.mxu0 %v394_v21  ;;  %839 = vmatprep.subr.mxu1 %v505_v10  ;;  %v218_v21 = vld [vmem:[%s4211_s1 + $0xa0] sm:$0xff]  ;;  %v447_v8 = vld [vmem:[%s4211_s1 + $0x7c8] sm:$0xff] }
  0x94   : > { %789 = vmatmul.mubr.f32.vlgmr.msra.gmra.mxu0 %v2803_v22  ;;  %866 = vmatprep.subr.mxu0 %v387_v27  ;;  %v206_v27 = vld [vmem:[%s4211_s1 + $0x40] sm:$0xff] }
  0x95   : > { %867 = vmatpush1.msra.mxu0 %v386_v29  ;;  %840 = vmatpush2.msra.mxu1 %v504_v12  ;;  %v579_v29 = vld [vmem:[%s4211_s1 + $0xbe8] sm:$0xff]  ;;  %v446_v10 = vld [vmem:[%s4211_s1 + $0x7c0] sm:$0xff] }
  0x96   : > { %868 = vmatprep.subr.mxu0 %v375_v31  ;;  %841 = vmatprep.subr.mxu1 %v493_v14  ;;  %v578_v31 = vld [vmem:[%s4211_s1 + $0xbe0] sm:$0xff]  ;;  %v435_v12 = vld [vmem:[%s4211_s1 + $0x768] sm:$0xff] }
  0x97   : > { %869 = vmatpush1.msra.mxu0 %v374_v34  ;;  %842 = vmatpush2.msra.mxu1 %v492_v16  ;;  %v444_v34 = vld [vmem:[%s4211_s1 + $0x7b0] sm:$0xff]  ;;  %v434_v14 = vld [vmem:[%s4211_s1 + $0x760] sm:$0xff]  ;;  %v423_v16 = vld [vmem:[%s4211_s1 + $0x708] sm:$0xff] }
  0x98   : > { %870 = vmatprep.subr.mxu0 %v363_v36  ;;  %843 = vmatprep.subr.mxu1 %v481_v18  ;;  %v433_v36 = vld [vmem:[%s4211_s1 + $0x758] sm:$0xff]  ;;  %v422_v18 = vld [vmem:[%s4211_s1 + $0x700] sm:$0xff] }
  0x99   : > { %871 = vmatpush1.msra.mxu0 %v362_v38  ;;  %844 = vmatpush2.msra.mxu1 %v480_v20  ;;  %v432_v38 = vld [vmem:[%s4211_s1 + $0x750] sm:$0xff]  ;;  %v411_v20 = vld [vmem:[%s4211_s1 + $0x6a8] sm:$0xff] }
  0x9a   : > { %872 = vmatprep.subr.mxu0 %v351_v40  ;;  %845 = vmatprep.subr.mxu1 %v469_v23  ;;  %v421_v40 = vld [vmem:[%s4211_s1 + $0x6f8] sm:$0xff]  ;;  %v410_v23 = vld [vmem:[%s4211_s1 + $0x6a0] sm:$0xff] }
  0x9b   : > { %873 = vmatpush1.msra.mxu0 %v350_v24  ;;  %846 = vmatpush2.msra.mxu1 %v468_v26  ;;  %v420_v24 = vld [vmem:[%s4211_s1 + $0x6f0] sm:$0xff]  ;;  %v399_v26 = vld [vmem:[%s4211_s1 + $0x648] sm:$0xff] }
  0x9c   : > { %874 = vmatprep.subr.mxu0 %v339_v43  ;;  %847 = vmatprep.subr.mxu1 %v457_v28  ;;  %v409_v43 = vld [vmem:[%s4211_s1 + $0x698] sm:$0xff]  ;;  %v398_v28 = vld [vmem:[%s4211_s1 + $0x640] sm:$0xff] }
  0x9d   : > { %875 = vmatpush1.msra.mxu0 %v338_v45  ;;  %848 = vmatpush2.msra.mxu1 %v456_v30  ;;  %v408_v45 = vld [vmem:[%s4211_s1 + $0x690] sm:$0xff]  ;;  %v257_v30 = vld [vmem:[%s4211_s1 + $0x1d8] sm:$0xff] }
  0x9e   : > { %876 = vmatprep.subr.mxu0 %v327_v47  ;;  %849 = vmatprep.subr.mxu1 %v445_v32  ;;  %v397_v47 = vld [vmem:[%s4211_s1 + $0x638] sm:$0xff] }
  0x9f   : > { %877 = vmatpush1.msra.mxu0 %v326_v49  ;;  %850 = vmatpush2.msra.mxu1 %v444_v34  ;;  %v396_v49 = vld [vmem:[%s4211_s1 + $0x630] sm:$0xff]  ;;  %v245_v32 = vld [vmem:[%s4211_s1 + $0x178] sm:$0xff] }
  0xa0   : > { %878 = vmatprep.subr.mxu0 %v315_v51  ;;  %851 = vmatprep.subr.mxu1 %v433_v36  ;;  %v389_v51 = vld [vmem:[%s4211_s1 + $0x5f8] sm:$0xff]  ;;  %v244_v34 = vld [vmem:[%s4211_s1 + $0x170] sm:$0xff] }
  0xa1   : > { %879 = vmatpush1.msra.mxu0 %v314_v53  ;;  %852 = vmatpush2.msra.mxu1 %v432_v38  ;;  %v507_v53 = vld [vmem:[%s4211_s1 + $0x9a8] sm:$0xff]  ;;  %v233_v36 = vld [vmem:[%s4211_s1 + $0x118] sm:$0xff]  ;;  %v232_v38 = vld [vmem:[%s4211_s1 + $0x110] sm:$0xff] }
  0xa2   : > { %880 = vmatprep.subr.mxu0 %v303_v55  ;;  %853 = vmatprep.subr.mxu1 %v421_v40  ;;  %v506_v55 = vld [vmem:[%s4211_s1 + $0x9a0] sm:$0xff]  ;;  %v220_v40 = vld [vmem:[%s4211_s1 + $0xb0] sm:$0xff] }
  0xa3   : > { %881 = vmatpush1.msra.mxu0 %v302_v57  ;;  %854 = vmatpush2.msra.mxu1 %v420_v24  ;;  %v495_v57 = vld [vmem:[%s4211_s1 + $0x948] sm:$0xff]  ;;  %v208_v24 = vld [vmem:[%s4211_s1 + $0x50] sm:$0xff] }
  0xa4   : > { %882 = vmatprep.subr.mxu0 %v291_v59  ;;  %855 = vmatprep.subr.mxu1 %v409_v43  ;;  %v494_v59 = vld [vmem:[%s4211_s1 + $0x940] sm:$0xff]  ;;  %v580_v43 = vld [vmem:[%s4211_s1 + $0xbf0] sm:$0xff] }
  0xa5   : > { %883 = vmatpush1.msra.mxu0 %v290_v61  ;;  %856 = vmatpush2.msra.mxu1 %v408_v45  ;;  %v353_v61 = vld [vmem:[%s4211_s1 + $0x4d8] sm:$0xff]  ;;  %v568_v45 = vld [vmem:[%s4211_s1 + $0xb90] sm:$0xff] }
  0xa6   : > { %884 = vmatprep.subr.mxu0 %v279_v63  ;;  %857 = vmatprep.subr.mxu1 %v397_v47  ;;  %v352_v63 = vld [vmem:[%s4211_s1 + $0x4d0] sm:$0xff] }
  0xa7   : > { %885 = vmatpush1.msra.mxu0 %v278_v1  ;;  %858 = vmatpush2.msra.mxu1 %v396_v49  ;;  %v341_v1 = vld [vmem:[%s4211_s1 + $0x478] sm:$0xff]  ;;  %v556_v47 = vld [vmem:[%s4211_s1 + $0xb30] sm:$0xff] }
  0xa8   : > { %886 = vmatprep.subr.mxu0 %v267_v3  ;;  %937 = vmatprep.subr.mxu1 %v389_v51  ;;  %v340_v3 = vld [vmem:[%s4211_s1 + $0x470] sm:$0xff] }
  0xa9   : > { %887 = vmatpush1.msra.mxu0 %v266_v5  ;;  %860 = vmatmul.mubr.f32.vlgmr.msra.gmra.mxu1 %v2803_v22  ;;  %v364_v22 = vld [vmem:[%s4211_s1 + $0x530] sm:$0xff]  ;;  %v329_v5 = vld [vmem:[%s4211_s1 + $0x418] sm:$0xff] }
  0xaa   : > { %888 = vmatprep.subr.mxu0 %v255_v7  ;;  %938 = vmatpush1.msra.mxu1 %v388_v52  ;;  %v328_v7 = vld [vmem:[%s4211_s1 + $0x410] sm:$0xff]  ;;  %v521_v52 = vld [vmem:[%s4211_s1 + $0xa18] sm:$0xff] }
  0xab   : > { %889 = vmatpush1.msra.mxu0 %v254_v9  ;;  %939 = vmatprep.subr.mxu1 %v377_v54  ;;  %v317_v9 = vld [vmem:[%s4211_s1 + $0x3b8] sm:$0xff]  ;;  %v544_v49 = vld [vmem:[%s4211_s1 + $0xad0] sm:$0xff] }
  0xac   : > { %890 = vmatprep.subr.mxu0 %v243_v11  ;;  %940 = vmatpush1.msra.mxu1 %v376_v56  ;;  %v316_v11 = vld [vmem:[%s4211_s1 + $0x3b0] sm:$0xff]  ;;  %v509_v54 = vld [vmem:[%s4211_s1 + $0x9b8] sm:$0xff] }
  0xad   : > { %891 = vmatpush1.msra.mxu0 %v242_v13  ;;  %941 = vmatprep.subr.mxu1 %v365_v58  ;;  %v305_v13 = vld [vmem:[%s4211_s1 + $0x358] sm:$0xff]  ;;  %v532_v51 = vld [vmem:[%s4211_s1 + $0xa70] sm:$0xff] }
  0xae   : > { %892 = vmatprep.subr.mxu0 %v231_v15  ;;  %942 = vmatpush1.msra.mxu1 %v364_v22  ;;  %v304_v15 = vld [vmem:[%s4211_s1 + $0x350] sm:$0xff]  ;;  %v497_v56 = vld [vmem:[%s4211_s1 + $0x958] sm:$0xff] }
  0xaf   : > { %893 = vmatpush1.msra.mxu0 %v230_v17  ;;  %943 = vmatprep.subr.mxu1 %v353_v61  ;;  %v293_v17 = vld [vmem:[%s4211_s1 + $0x2f8] sm:$0xff] }
  0xb0   : > { %894 = vmatprep.subr.mxu0 %v219_v19  ;;  %944 = vmatpush1.msra.mxu1 %v352_v63  ;;  %v292_v19 = vld [vmem:[%s4211_s1 + $0x2f0] sm:$0xff]  ;;  %v485_v58 = vld [vmem:[%s4211_s1 + $0x8f8] sm:$0xff] }
  0xb1   : > { %895 = vmatpush1.msra.mxu0 %v218_v21  ;;  %945 = vmatprep.subr.mxu1 %v341_v1  ;;  %v281_v21 = vld [vmem:[%s4211_s1 + $0x298] sm:$0xff] }
  0xb2   : > { %896 = vmatprep.subr.mxu0 %v207_v25  ;;  %946 = vmatpush1.msra.mxu1 %v340_v3  ;;  %v280_v25 = vld [vmem:[%s4211_s1 + $0x290] sm:$0xff]  ;;  %v473_v22 = vld [vmem:[%s4211_s1 + $0x898] sm:$0xff] }
  0xb3   : > { %897 = vmatpush1.msra.mxu0 %v206_v27  ;;  %947 = vmatprep.subr.mxu1 %v329_v5  ;;  %v269_v27 = vld [vmem:[%s4211_s1 + $0x238] sm:$0xff] }
  0xb4   : > { %898 = vmatprep.subr.mxu0 %v579_v29  ;;  %948 = vmatpush1.msra.mxu1 %v328_v7  ;;  %v268_v29 = vld [vmem:[%s4211_s1 + $0x230] sm:$0xff]  ;;  %v461_v61 = vld [vmem:[%s4211_s1 + $0x838] sm:$0xff] }
  0xb5   : > { %899 = vmatpush2.msra.mxu0 %v578_v31  ;;  %949 = vmatprep.subr.mxu1 %v317_v9  ;;  %v256_v31 = vld [vmem:[%s4211_s1 + $0x1d0] sm:$0xff]  ;;  %v449_v63 = vld [vmem:[%s4211_s1 + $0x7d8] sm:$0xff] }
  0xb6   : > { %900 = vmatprep.subr.mxu0 %v567_v33  ;;  %950 = vmatpush1.msra.mxu1 %v316_v11  ;;  %v2394_v33 = vld [vmem:[%s2603_s14 + $0x8] sm:$0xff]  ;;  %v437_v1 = vld [vmem:[%s4211_s1 + $0x778] sm:$0xff] }
  0xb7   : > { %901 = vmatpush2.msra.mxu0 %v566_v35  ;;  %951 = vmatprep.subr.mxu1 %v305_v13  ;;  %v3596_v35 = vld [vmem:[%s2603_s14] sm:$0xff]  ;;  %v425_v3 = vld [vmem:[%s4211_s1 + $0x718] sm:$0xff]  ;;  %s2402_s14 = scalar_lea.vmem %s2401_s19, 512 }
  0xb8   : > { %902 = vmatprep.subr.mxu0 %v555_v37  ;;  %952 = vmatpush1.msra.mxu1 %v304_v15  ;;  %v2458_v37 = vmov 0.0   ;;  %v413_v5 = vld [vmem:[%s4211_s1 + $0x6b8] sm:$0xff]  ;;  %p2404_p1 = scmp.lt.s32.totalorder %s2402_s14, %s2396_s10 }
  0xb9   : > { %903 = vmatpush2.msra.mxu0 %v554_v39  ;;  %953 = vmatprep.subr.mxu1 %v293_v17  ;;  %v221_v39 = vld [vmem:[%s4211_s1 + $0xb8] sm:$0xff] }
  0xba   : > { %904 = vmatprep.subr.mxu0 %v543_v41  ;;  %954 = vmatpush1.msra.mxu1 %v292_v19  ;;  %v209_v41 = vld [vmem:[%s4211_s1 + $0x58] sm:$0xff]  ;;  %p2405_p2 = por %p2404_p1, %p2403_p0 }
  0xbb   : > { %905 = vmatpush2.msra.mxu0 %v542_v42  ;;  %955 = vmatprep.subr.mxu1 %v281_v21  ;;  %v581_v42 = vld [vmem:[%s4211_s1 + $0xbf8] sm:$0xff] }
  0xbc   : > { %906 = vmatprep.subr.mxu0 %v531_v44  ;;  %956 = vmatpush1.msra.mxu1 %v280_v25  ;;  %v569_v44 = vld [vmem:[%s4211_s1 + $0xb98] sm:$0xff]  ;;  %p2406_p3 = pnand %p2405_p2, %p2399_p13 }
  0xbd   : > { %907 = vmatpush2.msra.mxu0 %v530_v46  ;;  %957 = vmatprep.subr.mxu1 %v269_v27  ;;  %v557_v46 = vld [vmem:[%s4211_s1 + $0xb38] sm:$0xff]  ;;  %v2460_v27 = vmov -1e+30  }
  0xbe   : > { %908 = vmatprep.subr.mxu0 %v519_v48  ;;  %958 = vmatpush1.msra.mxu1 %v268_v29  ;;  %v545_v48 = vld [vmem:[%s4211_s1 + $0xad8] sm:$0xff] }
  0xbf   : > { %909 = vmatpush2.msra.mxu0 %v518_v50  ;;  %930 = vmatprep.mubr.f32.mxu0 %v2394_v33  ;;  %v533_v50 = vld [vmem:[%s4211_s1 + $0xa78] sm:$0xff] }
  0xc0   : > { %910 = vmatprep.subr.mxu0 %v507_v53  ;;  %959 = vmatprep.subr.mxu1 %v257_v30  ;;  %v520_v53 = vld [vmem:[%s4211_s1 + $0xa10] sm:$0xff]  ;;  %v401_v7 = vld [vmem:[%s4211_s1 + $0x658] sm:$0xff] }
  0xc1   : > { %911 = vmatpush2.msra.mxu0 %v506_v55  ;;  %960 = vmatpush1.msra.mxu1 %v256_v31  ;;  %v508_v55 = vld [vmem:[%s4211_s1 + $0x9b0] sm:$0xff] }
  0xc2   : > { %912 = vmatprep.subr.mxu0 %v495_v57  ;;  %961 = vmatprep.subr.mxu1 %v245_v32  ;;  %v496_v57 = vld [vmem:[%s4211_s1 + $0x950] sm:$0xff] }
  0xc3   : > { %913 = vmatpush2.msra.mxu0 %v494_v59  ;;  %1001 = vmatprep.mubr.f32.mxu1 %v2394_v33  ;;  %v484_v59 = vld [vmem:[%s4211_s1 + $0x8f0] sm:$0xff] }
  0xc4   : > { %914 = vmatprep.subr.mxu0 %v483_v60  ;;  %962 = vmatpush1.msra.mxu1 %v244_v34  ;;  %v472_v60 = vld [vmem:[%s4211_s1 + $0x890] sm:$0xff] }
  0xc5   : > { %915 = vmatpush2.msra.mxu0 %v482_v62  ;;  %963 = vmatprep.subr.mxu1 %v233_v36  ;;  %v460_v62 = vld [vmem:[%s4211_s1 + $0x830] sm:$0xff] }
  0xc6   : > { %916 = vmatprep.subr.mxu0 %v471_v0  ;;  %964 = vmatpush1.msra.mxu1 %v232_v38  ;;  %v448_v0 = vld [vmem:[%s4211_s1 + $0x7d0] sm:$0xff] }
  0xc7   : > { %917 = vmatpush2.msra.mxu0 %v470_v2  ;;  %965 = vmatprep.subr.mxu1 %v221_v39  ;;  %v436_v2 = vld [vmem:[%s4211_s1 + $0x770] sm:$0xff] }
  0xc8   : > { %918 = vmatprep.subr.mxu0 %v459_v4  ;;  %966 = vmatpush1.msra.mxu1 %v220_v40  ;;  %v424_v4 = vld [vmem:[%s4211_s1 + $0x710] sm:$0xff] }
  0xc9   : > { %919 = vmatpush2.msra.mxu0 %v458_v6  ;;  %967 = vmatprep.subr.mxu1 %v209_v41  ;;  %v412_v6 = vld [vmem:[%s4211_s1 + $0x6b0] sm:$0xff] }
  0xca   : > { %920 = vmatprep.subr.mxu0 %v447_v8  ;;  %968 = vmatpush1.msra.mxu1 %v208_v24  ;;  %v400_v8 = vld [vmem:[%s4211_s1 + $0x650] sm:$0xff] }
  0xcb   : > { %921 = vmatpush2.msra.mxu0 %v446_v10  ;;  %969 = vmatprep.subr.mxu1 %v581_v42 }
  0xcc   : > { %922 = vmatprep.subr.mxu0 %v435_v12  ;;  %970 = vmatpush2.msra.mxu1 %v580_v43 }
  0xcd   : > { %923 = vmatpush2.msra.mxu0 %v434_v14  ;;  %971 = vmatprep.subr.mxu1 %v569_v44 }
  0xce   : > { %924 = vmatprep.subr.mxu0 %v423_v16  ;;  %972 = vmatpush2.msra.mxu1 %v568_v45 }
  0xcf   : > { %925 = vmatpush2.msra.mxu0 %v422_v18  ;;  %973 = vmatprep.subr.mxu1 %v557_v46  ;;  %v1008_v18 = vlaneseq }
  0xd0   : > { %926 = vmatprep.subr.mxu0 %v411_v20  ;;  %974 = vmatpush2.msra.mxu1 %v556_v47 }
  0xd1   : > { %927 = vmatpush2.msra.mxu0 %v410_v23  ;;  %975 = vmatprep.subr.mxu1 %v545_v48  ;;  %v3734_v20 = vshrl.u32 %v1008_v18, 7  ;;  %v1011_v21 = vand.u32 127, %v1008_v18  ;;  %v1202_v48 = vld [vmem:[%s4212_s2 + $0xf8] sm:$0xff]  ;;  %v1187_v18 = vld [vmem:[%s4212_s2 + $0x80] sm:$0xff] }
  0xd2   : > { %928 = vmatprep.subr.mxu0 %v399_v26  ;;  %976 = vmatpush2.msra.mxu1 %v544_v49  ;;  %v2206_v49 = vld [vmem:[%s4212_s2 + $0x1f8] sm:$0xff] }
  0xd3   : > { %929 = vmatpush2.msra.mxu0 %v398_v28  ;;  %977 = vmatprep.subr.mxu1 %v533_v50  ;;  %vm1012_vm1 = vcmp.le.s32.totalorder %v1011_v21, %v3734_v20  ;;  %v2195_v21 = vld [vmem:[%s4212_s2 + $0x1a0] sm:$0xff] }
  0xd4   : > { %931 = vmatmul.mubr.f32.vlgmr.msra.gmra.mxu0 %v3596_v35  ;;  %2296 = vmatprep.subr.mxu0 %v2458_v37  ;;  %v3741_v28 = vsel %vm1012_vm1, 0.0, %v2460_v27  ;;  %v2194_v27 = vld [vmem:[%s4212_s2 + $0x198] sm:$0xff] }
  0xd5   : > { %2298 = vmatprep.mubr.msk.f32.mxu0 %vm2459_vm0, %v2458_v37  ;;  %978 = vmatpush2.msra.mxu1 %v532_v51 }
  0xd6   : > { %979 = vmatprep.subr.mxu1 %v521_v52 }
  0xd7   : > { %980 = vmatpush2.msra.mxu1 %v520_v53 }
  0xd8   : > { %981 = vmatprep.subr.mxu1 %v509_v54  ;;  %v1201_v54 = vld [vmem:[%s4212_s2 + $0xf0] sm:$0xff] }
  0xd9   : > { %982 = vmatpush2.msra.mxu1 %v508_v55  ;;  %v1200_v55 = vld [vmem:[%s4212_s2 + $0xe8] sm:$0xff] }
  0xda   : > { %983 = vmatprep.subr.mxu1 %v497_v56  ;;  %v1199_v56 = vld [vmem:[%s4212_s2 + $0xe0] sm:$0xff] }
  0xdb   : > { %984 = vmatpush2.msra.mxu1 %v496_v57 }
  0xdc   : > { %985 = vmatprep.subr.mxu1 %v485_v58  ;;  %v1198_v58 = vld [vmem:[%s4212_s2 + $0xd8] sm:$0xff] }
  0xdd   : > { %986 = vmatpush2.msra.mxu1 %v484_v59 }
  0xde   : > { %987 = vmatprep.subr.mxu1 %v473_v22  ;;  %v1197_v22 = vld [vmem:[%s4212_s2 + $0xd0] sm:$0xff] }
  0xdf   : > { %988 = vmatpush2.msra.mxu1 %v472_v60  ;;  %v2205_v60 = vld [vmem:[%s4212_s2 + $0x1f0] sm:$0xff] }
  0xe0   : > { %989 = vmatprep.subr.mxu1 %v461_v61  ;;  %v1196_v61 = vld [vmem:[%s4212_s2 + $0xc8] sm:$0xff] }
  0xe1   : > { %990 = vmatpush2.msra.mxu1 %v460_v62  ;;  %v2204_v62 = vld [vmem:[%s4212_s2 + $0x1e8] sm:$0xff] }
  0xe2   : > { %991 = vmatprep.subr.mxu1 %v449_v63  ;;  %v1195_v63 = vld [vmem:[%s4212_s2 + $0xc0] sm:$0xff] }
  0xe3   : > { %992 = vmatpush2.msra.mxu1 %v448_v0  ;;  %v2203_v0 = vld [vmem:[%s4212_s2 + $0x1e0] sm:$0xff] }
  0xe4   : > { %993 = vmatprep.subr.mxu1 %v437_v1  ;;  %v1194_v1 = vld [vmem:[%s4212_s2 + $0xb8] sm:$0xff] }
  0xe5   : > { %994 = vmatpush2.msra.mxu1 %v436_v2  ;;  %v2202_v2 = vld [vmem:[%s4212_s2 + $0x1d8] sm:$0xff] }
  0xe6   : > { %995 = vmatprep.subr.mxu1 %v425_v3  ;;  %v1193_v3 = vld [vmem:[%s4212_s2 + $0xb0] sm:$0xff] }
  0xe7   : > { %996 = vmatpush2.msra.mxu1 %v424_v4  ;;  %v2201_v4 = vld [vmem:[%s4212_s2 + $0x1d0] sm:$0xff] }
  0xe8   : > { %997 = vmatprep.subr.mxu1 %v413_v5  ;;  %v1192_v5 = vld [vmem:[%s4212_s2 + $0xa8] sm:$0xff] }
  0xe9   : > { %998 = vmatpush2.msra.mxu1 %v412_v6  ;;  %v2200_v6 = vld [vmem:[%s4212_s2 + $0x1c8] sm:$0xff] }
  0xea   : > { %999 = vmatprep.subr.mxu1 %v401_v7  ;;  %v1191_v7 = vld [vmem:[%s4212_s2 + $0xa0] sm:$0xff] }
  0xeb   : > { %1000 = vmatpush2.msra.mxu1 %v400_v8  ;;  %v2199_v8 = vld [vmem:[%s4212_s2 + $0x1c0] sm:$0xff] }
  0xec   : > { %1002 = vmatmul.mubr.f32.vlgmr.msra.gmra.mxu1 %v3596_v35  ;;  %2306 = vmatprep.subr.mxu1 %v2458_v37 }
  0xed   : > { %2308 = vmatprep.mubr.msk.f32.mxu1 %vm2459_vm0, %v2458_v37 }
 0x114   : > { %v648_v9 = vpop.f32.mrf.mxu0 }
 0x116   : > { %v650_v10 = vpop.f32.mrf.mxu0 }
 0x126   : > { %v3726_v15 = vpop.f32.mrf.mxu1 }
 0x128   : > { %v3728_v16 = vpop.f32.mrf.mxu1 }
 0x154   : > { %v790_v11 = vpop.f32.mrf.mxu0 }
 0x155   : > { %2297 = vmatpush3.xpose.msra.mxu0 %v790_v11  ;;  %v1189_v11 = vld [vmem:[%s4212_s2 + $0x90] sm:$0xff] }
 0x156   : > { %v792_v12 = vpop.f32.mrf.mxu0  ;;  %2301 = vmatprep.subr.mxu0 %v2458_v37 }
 0x157   : > { %2307 = vmatpush3.xpose.msra.mxu1 %v792_v12  ;;  %v2197_v12 = vld [vmem:[%s4212_s2 + $0x1b0] sm:$0xff] }
 0x158   : > { %2299 = vmatmul.mubr.f32.vlgmr.msra.gmra.mxu0 %v648_v9  ;;  %2311 = vmatprep.subr.mxu1 %v2458_v37  ;;  %v1190_v9 = vld [vmem:[%s4212_s2 + $0x98] sm:$0xff] }
 0x159   : > { %2303 = vmatprep.mubr.msk.f32.mxu0 %vm2459_vm0, %v2458_v37 }
 0x15a   : > { %2309 = vmatmul.mubr.f32.vlgmr.msra.gmra.mxu1 %v650_v10  ;;  %v2198_v10 = vld [vmem:[%s4212_s2 + $0x1b8] sm:$0xff] }
 0x15b   : > { %2313 = vmatprep.mubr.msk.f32.mxu1 %vm2459_vm0, %v2458_v37 }
 0x169   : > { %v3730_v17 = vpop.f32.mrf.mxu1 }
 0x16b   : > { %v3732_v19 = vpop.f32.mrf.mxu1 }
 0x194   : > { %v932_v13 = vpop.f32.mrf.mxu0 }
 0x195   : > { %2302 = vmatpush3.msra.mxu0 %v932_v13  ;;  %v1188_v13 = vld [vmem:[%s4212_s2 + $0x88] sm:$0xff] }
 0x196   : > { %v934_v14 = vpop.f32.mrf.mxu0  ;;  %1203 = vmatprep.subr.mxu0 %v1202_v48  ;;  %v2184_v48 = vld [vmem:[%s4212_s2 + $0x148] sm:$0xff] }
 0x197   : > { %2312 = vmatpush3.msra.mxu1 %v934_v14  ;;  %v2196_v14 = vld [vmem:[%s4212_s2 + $0x1a8] sm:$0xff] }
 0x198   : > { %1465 = vmatprep.subr.mxu1 %v2206_v49  ;;  %v1175_v49 = vld [vmem:[%s4212_s2 + $0x20] sm:$0xff] }
 0x1ac   : > { %v3736_v23 = vpop.f32.mrf.mxu1 }
 0x1ae   : > { %v3739_v25 = vpop.f32.mrf.mxu1 }
 0x218   : > { %v1080_v26 = vpop.f32.mrf.mxu0 }
 0x219   : > { %v1084_v29 = vmul.f32 0.16012815, %v1080_v26  ;;  %v1186_v26 = vld [vmem:[%s4212_s2 + $0x78] sm:$0xff] }
 0x21a   : > { %v2300_v30 = vpop.f32.mrf.mxu0  ;;  %v1342_v31 = vpop.f32.mrf.mxu1 }
 0x21b   : > { %v1346_v32 = vmul.f32 0.16012815, %v1342_v31  ;;  %v1085_v33 = vadd.f32 %v1084_v29, %v3741_v28  ;;  %v1185_v29 = vld [vmem:[%s4212_s2 + $0x70] sm:$0xff]  ;;  %v1184_v31 = vld [vmem:[%s4212_s2 + $0x68] sm:$0xff] }
 0x21c   : > { %v2310_v34 = vpop.f32.mrf.mxu1  ;;  %v2193_v30 = vld [vmem:[%s4212_s2 + $0x190] sm:$0xff] }
 0x21d   : > { %v1087_v35 = vsel %vm1086_vm2, %v1085_v33, -inf  ;;  %v1347_v36 = vadd.f32 %v1346_v32, %v3741_v28  ;;  %v2192_v32 = vld [vmem:[%s4212_s2 + $0x188] sm:$0xff]  ;;  %v2191_v34 = vld [vmem:[%s4212_s2 + $0x180] sm:$0xff] }
 0x21e   : > { %1088 = vmax.xlane.f32.xlu0 %v1087_v35  ;;  %v1182_v35 = vld [vmem:[%s4212_s2 + $0x58] sm:$0xff] }
 0x21f   : > { %v1348_v38 = vsel %vm1086_vm2, %v1347_v36, -inf }
 0x222   : > { %1349 = vmax.xlane.f32.xlu0 %v1348_v38  ;;  %v1181_v38 = vld [vmem:[%s4212_s2 + $0x50] sm:$0xff] }
 0x2a7   : > { %v1089_v39 = vpop.xlane.xlu0 %1088 }
 0x2a8   : > { %v1090_v40 = vsub.f32 %v1085_v33, %v1089_v39  ;;  %v1183_v33 = vld [vmem:[%s4212_s2 + $0x60] sm:$0xff]  ;;  %v2189_v39 = vld [vmem:[%s4212_s2 + $0x170] sm:$0xff] }
 0x2aa   : > { %v1091_v41 = vmul.f32 1.442695, %v1090_v40  ;;  %v1180_v40 = vld [vmem:[%s4212_s2 + $0x48] sm:$0xff] }
 0x2ab   : > { %v1350_v24 = vpop.xlane.xlu0 %1349 }
 0x2ac   : > { %2378 = vpow2.f32 %v1091_v41  ;;  %v1351_v42 = vsub.f32 %v1347_v36, %v1350_v24  ;;  %v2190_v36 = vld [vmem:[%s4212_s2 + $0x178] sm:$0xff]  ;;  %v2188_v41 = vld [vmem:[%s4212_s2 + $0x168] sm:$0xff]  ;;  %v1179_v24 = vld [vmem:[%s4212_s2 + $0x40] sm:$0xff] }
 0x2ae   : > { %v1352_v43 = vmul.f32 1.442695, %v1351_v42  ;;  %v2187_v42 = vld [vmem:[%s4212_s2 + $0x160] sm:$0xff] }
 0x2b0   : > { %2380 = vpow2.f32 %v1352_v43  ;;  %v1178_v43 = vld [vmem:[%s4212_s2 + $0x38] sm:$0xff] }
 0x2b9   : > { %v2379_v44 = vpop.eup %2378 }
 0x2ba   : > { %v1093_v45 = vsel %vm1086_vm2, %v2379_v44, 0.0 }
 0x2bb   : > { %1094 = vadd.xlane.f32.xlu1 %v1093_v45  ;;  %v1177_v45 = vld [vmem:[%s4212_s2 + $0x30] sm:$0xff] }
 0x2bd   : > { %v2381_v46 = vpop.eup %2380 }
 0x2be   : > { %v1354_v47 = vsel %vm1086_vm2, %v2381_v46, 0.0 }
 0x2bf   : > { %1355 = vadd.xlane.f32.xlu1 %v1354_v47  ;;  %v1176_v47 = vld [vmem:[%s4212_s2 + $0x28] sm:$0xff] }
 0x344   : > { %v1095_v50 = vpop.xlane.xlu1 %1094 }
 0x345   : > { %2382 = vrcp.f32 %v1095_v50  ;;  %v2183_v50 = vld [vmem:[%s4212_s2 + $0x140] sm:$0xff] }
 0x348   : > { %v1356_v51 = vpop.xlane.xlu1 %1355 }
 0x349   : > { %2384 = vrcp.f32 %v1356_v51  ;;  %v1174_v51 = vld [vmem:[%s4212_s2 + $0x18] sm:$0xff] }
 0x352   : > { %v2383_v52 = vpop.eup %2382 }
 0x353   : > { %v1097_v53 = vmul.f32 %v2383_v52, %v2379_v44  ;;  %v2186_v44 = vld [vmem:[%s4212_s2 + $0x158] sm:$0xff] }
 0x354   : > { %v2182_v52 = vld [vmem:[%s4212_s2 + $0x138] sm:$0xff] }
 0x355   : > { %2304 = vmatmul.mubr.msk.f32.vlgmr.msra.gmra.mxu0 %vm1086_vm2, %v1097_v53  ;;  %v1173_v53 = vld [vmem:[%s4212_s2 + $0x10] sm:$0xff] }
 0x356   : > { %v2385_v57 = vpop.eup %2384  ;;  %1204 = vmatpush1.msra.mxu0 %v1201_v54  ;;  %1267 = vmatprep.mubr.f32.mxu0 %v2458_v37  ;;  %v2181_v54 = vld [vmem:[%s4212_s2 + $0x130] sm:$0xff] }
 0x357   : > { %v1358_v59 = vmul.f32 %v2385_v57, %v2381_v46  ;;  %1205 = vmatprep.subr.mxu0 %v1200_v55  ;;  %v2185_v46 = vld [vmem:[%s4212_s2 + $0x150] sm:$0xff]  ;;  %v1172_v55 = vld [vmem:[%s4212_s2 + $0x8] sm:$0xff]  ;;  %v1171_v57 = vld [vmem:[%s4212_s2] sm:$0xff] }
 0x358   : > { %1206 = vmatpush1.msra.mxu0 %v1199_v56  ;;  %v2180_v56 = vld [vmem:[%s4212_s2 + $0x128] sm:$0xff] }
 0x359   : > { %2314 = vmatmul.mubr.msk.f32.vlgmr.msra.gmra.mxu1 %vm1086_vm2, %v1358_v59  ;;  %1207 = vmatprep.subr.mxu0 %v1198_v58  ;;  %v2179_v58 = vld [vmem:[%s4212_s2 + $0x120] sm:$0xff]  ;;  %v2178_v59 = vld [vmem:[%s4212_s2 + $0x118] sm:$0xff] }
 0x35a   : > { %1208 = vmatpush1.msra.mxu0 %v1197_v22  ;;  %1466 = vmatpush1.msra.mxu1 %v2205_v60  ;;  %v2177_v22 = vld [vmem:[%s4212_s2 + $0x110] sm:$0xff]  ;;  %v2176_v60 = vld [vmem:[%s4212_s2 + $0x108] sm:$0xff] }
 0x35b   : > { %1209 = vmatprep.subr.mxu0 %v1196_v61  ;;  %1467 = vmatprep.subr.mxu1 %v2204_v62  ;;  %v2175_v61 = vld [vmem:[%s4212_s2 + $0x100] sm:$0xff] }
 0x35c   : > { %1210 = vmatpush1.msra.mxu0 %v1195_v63  ;;  %1468 = vmatpush1.msra.mxu1 %v2203_v0 }
 0x35d   : > { %1211 = vmatprep.subr.mxu0 %v1194_v1  ;;  %1469 = vmatprep.subr.mxu1 %v2202_v2 }
 0x35e   : > { %1212 = vmatpush1.msra.mxu0 %v1193_v3  ;;  %1470 = vmatpush1.msra.mxu1 %v2201_v4 }
 0x35f   : > { %1213 = vmatprep.subr.mxu0 %v1192_v5  ;;  %1471 = vmatprep.subr.mxu1 %v2200_v6 }
 0x360   : > { %1214 = vmatpush1.msra.mxu0 %v1191_v7  ;;  %1472 = vmatpush1.msra.mxu1 %v2199_v8 }
 0x361   : > { %1215 = vmatprep.subr.mxu0 %v1190_v9  ;;  %1473 = vmatprep.subr.mxu1 %v2198_v10 }
 0x362   : > { %1216 = vmatpush1.msra.mxu0 %v1189_v11  ;;  %1474 = vmatpush1.msra.mxu1 %v2197_v12 }
 0x363   : > { %1217 = vmatprep.subr.mxu0 %v1188_v13  ;;  %1475 = vmatprep.subr.mxu1 %v2196_v14 }
 0x364   : > { %1218 = vmatpush1.msra.mxu0 %v1187_v18  ;;  %1476 = vmatpush1.msra.mxu1 %v2195_v21 }
 0x365   : > { %1219 = vmatprep.subr.mxu0 %v1186_v26  ;;  %1477 = vmatprep.subr.mxu1 %v2194_v27 }
 0x366   : > { %1220 = vmatpush1.msra.mxu0 %v1185_v29  ;;  %1478 = vmatpush1.msra.mxu1 %v2193_v30 }
 0x367   : > { %1221 = vmatprep.subr.mxu0 %v1184_v31  ;;  %1479 = vmatprep.subr.mxu1 %v2192_v32  ;;  %v2272_v32 = vld [vmem:[%s4212_s2 + $0x3f8] sm:$0xff] }
 0x368   : > { %1222 = vmatpush1.msra.mxu0 %v1183_v33  ;;  %1480 = vmatpush1.msra.mxu1 %v2191_v34 }
 0x369   : > { %1223 = vmatprep.subr.mxu0 %v1182_v35  ;;  %1481 = vmatprep.subr.mxu1 %v2190_v36 }
 0x36a   : > { %1224 = vmatpush1.msra.mxu0 %v1181_v38  ;;  %1482 = vmatpush1.msra.mxu1 %v2189_v39  ;;  %v2238_v38 = vld [vmem:[%s4212_s2 + $0x2f0] sm:$0xff]  ;;  %v2237_v39 = vld [vmem:[%s4212_s2 + $0x2e8] sm:$0xff] }
 0x36b   : > { %1225 = vmatprep.subr.mxu0 %v1180_v40  ;;  %1483 = vmatprep.subr.mxu1 %v2188_v41  ;;  %v2236_v40 = vld [vmem:[%s4212_s2 + $0x2e0] sm:$0xff] }
 0x36c   : > { %1226 = vmatpush1.msra.mxu0 %v1179_v24  ;;  %1484 = vmatpush1.msra.mxu1 %v2187_v42  ;;  %v2235_v24 = vld [vmem:[%s4212_s2 + $0x2d8] sm:$0xff] }
 0x36d   : > { %1227 = vmatprep.subr.mxu0 %v1178_v43  ;;  %1485 = vmatprep.subr.mxu1 %v2186_v44  ;;  %v2234_v43 = vld [vmem:[%s4212_s2 + $0x2d0] sm:$0xff] }
 0x36e   : > { %1228 = vmatpush1.msra.mxu0 %v1177_v45  ;;  %1486 = vmatpush1.msra.mxu1 %v2185_v46  ;;  %v2271_v44 = vld [vmem:[%s4212_s2 + $0x3f0] sm:$0xff]  ;;  %v2233_v45 = vld [vmem:[%s4212_s2 + $0x2c8] sm:$0xff] }
 0x36f   : > { %1229 = vmatprep.subr.mxu0 %v1176_v47  ;;  %1487 = vmatprep.subr.mxu1 %v2184_v48  ;;  %v2270_v46 = vld [vmem:[%s4212_s2 + $0x3e8] sm:$0xff]  ;;  %v2232_v47 = vld [vmem:[%s4212_s2 + $0x2c0] sm:$0xff] }
 0x370   : > { %1230 = vmatpush1.msra.mxu0 %v1175_v49  ;;  %1488 = vmatpush1.msra.mxu1 %v2183_v50  ;;  %v2269_v48 = vld [vmem:[%s4212_s2 + $0x3e0] sm:$0xff]  ;;  %v2231_v49 = vld [vmem:[%s4212_s2 + $0x2b8] sm:$0xff] }
 0x371   : > { %1231 = vmatprep.subr.mxu0 %v1174_v51  ;;  %1489 = vmatprep.subr.mxu1 %v2182_v52  ;;  %v2268_v50 = vld [vmem:[%s4212_s2 + $0x3d8] sm:$0xff]  ;;  %v2230_v51 = vld [vmem:[%s4212_s2 + $0x2b0] sm:$0xff] }
 0x372   : > { %1232 = vmatpush1.msra.mxu0 %v1173_v53  ;;  %1490 = vmatpush1.msra.mxu1 %v2181_v54  ;;  %v2267_v52 = vld [vmem:[%s4212_s2 + $0x3d0] sm:$0xff]  ;;  %v2229_v53 = vld [vmem:[%s4212_s2 + $0x2a8] sm:$0xff] }
 0x373   : > { %1233 = vmatprep.subr.mxu0 %v1172_v55  ;;  %1491 = vmatprep.subr.mxu1 %v2180_v56  ;;  %v2266_v54 = vld [vmem:[%s4212_s2 + $0x3c8] sm:$0xff]  ;;  %v2228_v55 = vld [vmem:[%s4212_s2 + $0x2a0] sm:$0xff] }
 0x374   : > { %1234 = vmatpush1.msra.mxu0 %v1171_v57  ;;  %1492 = vmatpush1.msra.mxu1 %v2179_v58  ;;  %v2265_v56 = vld [vmem:[%s4212_s2 + $0x3c0] sm:$0xff]  ;;  %v2227_v57 = vld [vmem:[%s4212_s2 + $0x298] sm:$0xff] }
 0x375   : > { %2316 = vmatprep.subr.mxu0 %v2458_v37  ;;  %1529 = vmatprep.mubr.f32.mxu1 %v2458_v37  ;;  %v2264_v58 = vld [vmem:[%s4212_s2 + $0x3b8] sm:$0xff] }
 0x376   : > { %1493 = vmatprep.subr.mxu1 %v2178_v59  ;;  %v2226_v59 = vld [vmem:[%s4212_s2 + $0x290] sm:$0xff] }
 0x377   : > { %1494 = vmatpush1.msra.mxu1 %v2177_v22  ;;  %v2263_v22 = vld [vmem:[%s4212_s2 + $0x3b0] sm:$0xff] }
 0x378   : > { %1495 = vmatprep.subr.mxu1 %v2176_v60  ;;  %v2225_v60 = vld [vmem:[%s4212_s2 + $0x288] sm:$0xff] }
 0x379   : > { %1496 = vmatpush1.msra.mxu1 %v2175_v61  ;;  %v2262_v61 = vld [vmem:[%s4212_s2 + $0x3a8] sm:$0xff] }
 0x37a   : > { %2326 = vmatprep.subr.mxu1 %v2458_v37 }
 0x415   : > { %v1167_v62 = vpop.f32.mrf.mxu0 }
 0x416   : > { %1268 = vmatmul.mubr.f32.vlgmr.msra.gmra.mxu0 %v1167_v62  ;;  %v2224_v62 = vld [vmem:[%s4212_s2 + $0x280] sm:$0xff] }
 0x417   : > { %2317 = vmatpush3.xpose.msra.mxu0 %v3730_v17  ;;  %v2305_v63 = vpop.f32.mrf.mxu0  ;;  %2318 = vmatprep.mubr.msk.f32.mxu0 %vm2459_vm0, %v2458_v37 }
 0x418   : > { %2321 = vmatprep.subr.mxu0 %v2458_v37  ;;  %v2261_v63 = vld [vmem:[%s4212_s2 + $0x3a0] sm:$0xff] }
 0x419   : > { %v1428_v0 = vpop.f32.mrf.mxu1 }
 0x41a   : > { %1530 = vmatmul.mubr.f32.vlgmr.msra.gmra.mxu1 %v1428_v0  ;;  %2319 = vmatmul.mubr.f32.vlgmr.msra.gmra.mxu0 %v3726_v15  ;;  %v2223_v0 = vld [vmem:[%s4212_s2 + $0x278] sm:$0xff] }
 0x41b   : > { %2322 = vmatpush3.msra.mxu0 %v3736_v23  ;;  %2327 = vmatpush3.xpose.msra.mxu1 %v3732_v19  ;;  %v2315_v1 = vpop.f32.mrf.mxu1 }
 0x41c   : > { %2328 = vmatprep.mubr.msk.f32.mxu1 %vm2459_vm0, %v2458_v37  ;;  %2331 = vmatprep.subr.mxu1 %v2458_v37  ;;  %v2260_v1 = vld [vmem:[%s4212_s2 + $0x398] sm:$0xff] }
 0x41d   : > { %2323 = vmatprep.mubr.msk.f32.mxu0 %vm2459_vm0, %v2458_v37 }
 0x41e   : > { %2329 = vmatmul.mubr.f32.vlgmr.msra.gmra.mxu1 %v3728_v16 }
 0x41f   : > { %2332 = vmatpush3.msra.mxu1 %v3739_v25  ;;  %2333 = vmatprep.mubr.msk.f32.mxu1 %vm2459_vm0, %v2458_v37 }
 0x420   : > { %1997 = vmatprep.subr.mxu1 %v2272_v32  ;;  %v2247_v32 = vld [vmem:[%s4212_s2 + $0x330] sm:$0xff] }
 0x4d6   : > { %v1269_v15 = vpop.f32.mrf.mxu0 }
 0x4d8   : > { %v1271_v17 = vpop.f32.mrf.mxu0 }
 0x4da   : > { %v1531_v23 = vpop.f32.mrf.mxu1  ;;  %v1608_v19 = vpop.f32.mrf.mxu0 }
 0x4db   : > { %v3963_v2 = vadd.f32 %v1531_v23, %v1269_v15  ;;  %v1612_v3 = vmul.f32 0.16012815, %v1608_v19  ;;  %v2222_v15 = vld [vmem:[%s4212_s2 + $0x270] sm:$0xff]  ;;  %v2221_v23 = vld [vmem:[%s4212_s2 + $0x268] sm:$0xff] }
 0x4dc   : > { %v1533_v4 = vpop.f32.mrf.mxu1  ;;  %v2320_v5 = vpop.f32.mrf.mxu0  ;;  %v2258_v19 = vld [vmem:[%s4212_s2 + $0x388] sm:$0xff] }
 0x4dd   : > { %v3965_v6 = vadd.f32 %v1533_v4, %v1271_v17  ;;  %v1613_v7 = vadd.f32 %v1612_v3, %v3741_v28  ;;  %v2259_v17 = vld [vmem:[%s4212_s2 + $0x390] sm:$0xff]  ;;  %v2220_v3 = vld [vmem:[%s4212_s2 + $0x260] sm:$0xff]  ;;  %v2219_v5 = vld [vmem:[%s4212_s2 + $0x258] sm:$0xff] }
 0x4de   : > { %v1874_v8 = vpop.f32.mrf.mxu1  ;;  %v2257_v4 = vld [vmem:[%s4212_s2 + $0x380] sm:$0xff] }
 0x4df   : > { %v1878_v16 = vmul.f32 0.16012815, %v1874_v8  ;;  %v1614_v25 = vsel %vm1086_vm2, %v1613_v7, -inf  ;;  %v2218_v8 = vld [vmem:[%s4212_s2 + $0x250] sm:$0xff] }
 0x4e0   : > { %v2330_v9 = vpop.f32.mrf.mxu1  ;;  %1615 = vmax.xlane.f32.xlu0 %v1614_v25  ;;  %v2217_v25 = vld [vmem:[%s4212_s2 + $0x248] sm:$0xff] }
 0x4e1   : > { %v1879_v10 = vadd.f32 %v1878_v16, %v3741_v28  ;;  %v2239_v28 = vld [vmem:[%s4212_s2 + $0x2f8] sm:$0xff]  ;;  %v2255_v16 = vld [vmem:[%s4212_s2 + $0x370] sm:$0xff]  ;;  %v2254_v9 = vld [vmem:[%s4212_s2 + $0x368] sm:$0xff] }
 0x4e2   : > { %1731 = vmatprep.subr.mxu0 %v2239_v28  ;;  %v2210_v28 = vld [vmem:[%s4212_s2 + $0x210] sm:$0xff] }
 0x4e3   : > { %v1880_v11 = vsel %vm1086_vm2, %v1879_v10, -inf }
 0x4e4   : > { %1881 = vmax.xlane.f32.xlu1 %v1880_v11  ;;  %v2253_v11 = vld [vmem:[%s4212_s2 + $0x360] sm:$0xff] }
 0x569   : > { %v1616_v12 = vpop.xlane.xlu0 %1615 }
 0x56a   : > { %v1617_v13 = vsub.f32 %v1613_v7, %v1616_v12  ;;  %v2256_v7 = vld [vmem:[%s4212_s2 + $0x378] sm:$0xff] }
 0x56b   : > { %v2215_v12 = vld [vmem:[%s4212_s2 + $0x238] sm:$0xff] }
 0x56c   : > { %v1618_v14 = vmul.f32 1.442695, %v1617_v13  ;;  %v2252_v13 = vld [vmem:[%s4212_s2 + $0x358] sm:$0xff] }
 0x56d   : > { %v1882_v18 = vpop.xlane.xlu1 %1881 }
 0x56e   : > { %2386 = vpow2.f32 %v1618_v14  ;;  %v1883_v21 = vsub.f32 %v1879_v10, %v1882_v18  ;;  %v2216_v10 = vld [vmem:[%s4212_s2 + $0x240] sm:$0xff]  ;;  %v2214_v14 = vld [vmem:[%s4212_s2 + $0x230] sm:$0xff] }
 0x56f   : > { %v2251_v18 = vld [vmem:[%s4212_s2 + $0x350] sm:$0xff] }
 0x570   : > { %v1884_v26 = vmul.f32 1.442695, %v1883_v21  ;;  %v2213_v21 = vld [vmem:[%s4212_s2 + $0x228] sm:$0xff] }
 0x572   : > { %2388 = vpow2.f32 %v1884_v26  ;;  %v2250_v26 = vld [vmem:[%s4212_s2 + $0x348] sm:$0xff] }
 0x57b   : > { %v2387_v27 = vpop.eup %2386 }
 0x57c   : > { %v1620_v29 = vsel %vm1086_vm2, %v2387_v27, 0.0 }
 0x57d   : > { %1621 = vadd.xlane.f32.xlu0 %v1620_v29  ;;  %v2249_v29 = vld [vmem:[%s4212_s2 + $0x340] sm:$0xff] }
 0x57f   : > { %v2389_v30 = vpop.eup %2388 }
 0x580   : > { %v1886_v31 = vsel %vm1086_vm2, %v2389_v30, 0.0 }
 0x581   : > { %1887 = vadd.xlane.f32.xlu1 %v1886_v31  ;;  %v2248_v31 = vld [vmem:[%s4212_s2 + $0x338] sm:$0xff] }
 0x606   : > { %v1622_v33 = vpop.xlane.xlu0 %1621 }
 0x607   : > { %2390 = vrcp.f32 %v1622_v33  ;;  %v2209_v33 = vld [vmem:[%s4212_s2 + $0x208] sm:$0xff] }
 0x60a   : > { %v1888_v34 = vpop.xlane.xlu1 %1887 }
 0x60b   : > { %2392 = vrcp.f32 %v1888_v34  ;;  %v2246_v34 = vld [vmem:[%s4212_s2 + $0x328] sm:$0xff] }
 0x614   : > { %v2391_v35 = vpop.eup %2390 }
 0x615   : > { %v1624_v36 = vmul.f32 %v2391_v35, %v2387_v27  ;;  %v2212_v27 = vld [vmem:[%s4212_s2 + $0x220] sm:$0xff] }
 0x616   : > { %v2208_v35 = vld [vmem:[%s4212_s2 + $0x200] sm:$0xff] }
 0x617   : > { %2324 = vmatmul.mubr.msk.f32.vlgmr.msra.gmra.mxu0 %vm1086_vm2, %v1624_v36  ;;  %v2245_v36 = vld [vmem:[%s4212_s2 + $0x320] sm:$0xff] }
 0x618   : > { %v2393_v41 = vpop.eup %2392  ;;  %1732 = vmatpush1.msra.mxu0 %v2238_v38  ;;  %1795 = vmatprep.mubr.f32.mxu0 %v2458_v37  ;;  %v2244_v38 = vld [vmem:[%s4212_s2 + $0x318] sm:$0xff] }
 0x619   : > { %v1890_v42 = vmul.f32 %v2393_v41, %v2389_v30  ;;  %1733 = vmatprep.subr.mxu0 %v2237_v39  ;;  %v2211_v30 = vld [vmem:[%s4212_s2 + $0x218] sm:$0xff]  ;;  %v2242_v39 = vld [vmem:[%s4212_s2 + $0x308] sm:$0xff] }
 0x61a   : > { %1734 = vmatpush1.msra.mxu0 %v2236_v40  ;;  %v2241_v40 = vld [vmem:[%s4212_s2 + $0x300] sm:$0xff] }
 0x61b   : > { %2334 = vmatmul.mubr.msk.f32.vlgmr.msra.gmra.mxu1 %vm1086_vm2, %v1890_v42  ;;  %1735 = vmatprep.subr.mxu0 %v2235_v24 }
 0x61c   : > { %1736 = vmatpush1.msra.mxu0 %v2234_v43  ;;  %1998 = vmatpush1.msra.mxu1 %v2271_v44  ;;  %v2080_v44 = vsub.s32 0, %v3734_v20 }
 0x61d   : > { %1737 = vmatprep.subr.mxu0 %v2233_v45  ;;  %1999 = vmatprep.subr.mxu1 %v2270_v46  ;;  %v2076_v46 = vld [vmem:[%s4213_s3] sm:$0x3] }
 0x61e   : > { %1738 = vmatpush1.msra.mxu0 %v2232_v47  ;;  %2000 = vmatpush1.msra.mxu1 %v2269_v48  ;;  %v2084_v47 = vsub.s32 1, %v3734_v20 }
 0x61f   : > { %1739 = vmatprep.subr.mxu0 %v2231_v49  ;;  %2001 = vmatprep.subr.mxu1 %v2268_v50  ;;  %v2081_v50 = vrot.slane %v2076_v46, %v2080_v44 }
 0x620   : > { %1740 = vmatpush1.msra.mxu0 %v2230_v51  ;;  %2002 = vmatpush1.msra.mxu1 %v2267_v52 }
 0x621   : > { %1741 = vmatprep.subr.mxu0 %v2229_v53  ;;  %2003 = vmatprep.subr.mxu1 %v2266_v54  ;;  %v2085_v54 = vrot.slane %v2076_v46, %v2084_v47 }
 0x622   : > { %1742 = vmatpush1.msra.mxu0 %v2228_v55  ;;  %2004 = vmatpush1.msra.mxu1 %v2265_v56 }
 0x623   : > { %1743 = vmatprep.subr.mxu0 %v2227_v57  ;;  %2005 = vmatprep.subr.mxu1 %v2264_v58 }
 0x624   : > { %1744 = vmatpush1.msra.mxu0 %v2226_v59  ;;  %2006 = vmatpush1.msra.mxu1 %v2263_v22 }
 0x625   : > { %1745 = vmatprep.subr.mxu0 %v2225_v60  ;;  %2007 = vmatprep.subr.mxu1 %v2262_v61 }
 0x626   : > { %1746 = vmatpush1.msra.mxu0 %v2224_v62  ;;  %2008 = vmatpush1.msra.mxu1 %v2261_v63 }
 0x627   : > { %1747 = vmatprep.subr.mxu0 %v2223_v0  ;;  %2009 = vmatprep.subr.mxu1 %v2260_v1 }
 0x628   : > { %1748 = vmatpush1.msra.mxu0 %v2222_v15  ;;  %2010 = vmatpush1.msra.mxu1 %v2259_v17 }
 0x629   : > { %1749 = vmatprep.subr.mxu0 %v2221_v23  ;;  %2011 = vmatprep.subr.mxu1 %v2258_v19 }
 0x62a   : > { %1750 = vmatpush1.msra.mxu0 %v2220_v3  ;;  %2012 = vmatpush1.msra.mxu1 %v2257_v4 }
 0x62b   : > { %1751 = vmatprep.subr.mxu0 %v2219_v5  ;;  %2013 = vmatprep.subr.mxu1 %v2256_v7 }
 0x62c   : > { %1752 = vmatpush1.msra.mxu0 %v2218_v8  ;;  %2014 = vmatpush1.msra.mxu1 %v2255_v16 }
 0x62d   : > { %1753 = vmatprep.subr.mxu0 %v2217_v25  ;;  %2015 = vmatprep.subr.mxu1 %v2254_v9 }
 0x62e   : > { %1754 = vmatpush1.msra.mxu0 %v2216_v10  ;;  %2016 = vmatpush1.msra.mxu1 %v2253_v11 }
 0x62f   : > { %1755 = vmatprep.subr.mxu0 %v2215_v12  ;;  %2017 = vmatprep.subr.mxu1 %v2252_v13 }
 0x630   : > { %1756 = vmatpush1.msra.mxu0 %v2214_v14  ;;  %2018 = vmatpush1.msra.mxu1 %v2251_v18 }
 0x631   : > { %1757 = vmatprep.subr.mxu0 %v2213_v21  ;;  %2019 = vmatprep.subr.mxu1 %v2250_v26 }
 0x632   : > { %1758 = vmatpush1.msra.mxu0 %v2212_v27  ;;  %2020 = vmatpush1.msra.mxu1 %v2249_v29 }
 0x633   : > { %1759 = vmatprep.subr.mxu0 %v2211_v30  ;;  %2021 = vmatprep.subr.mxu1 %v2248_v31 }
 0x634   : > { %1760 = vmatpush1.msra.mxu0 %v2210_v28  ;;  %2022 = vmatpush1.msra.mxu1 %v2247_v32 }
 0x635   : > { %1761 = vmatprep.subr.mxu0 %v2209_v33  ;;  %2023 = vmatprep.subr.mxu1 %v2246_v34 }
 0x636   : > { %2061 = vmatprep.mubr.f32.mxu1 %v2458_v37  ;;  %1762 = vmatpush1.msra.mxu0 %v2208_v35  ;;  %v2243_v37 = vld [vmem:[%s4212_s2 + $0x310] sm:$0xff] }
 0x637   : > { %2024 = vmatpush1.msra.mxu1 %v2245_v36 }
 0x638   : > { %2025 = vmatprep.subr.mxu1 %v2244_v38 }
 0x639   : > { %2026 = vmatpush1.msra.mxu1 %v2243_v37 }
 0x63a   : > { %2027 = vmatprep.subr.mxu1 %v2242_v39 }
 0x63b   : > { %2028 = vmatpush1.msra.mxu1 %v2241_v40 }
 0x6d7   : > { %v1694_v41 = vpop.f32.mrf.mxu0 }
 0x6d8   : > { %1796 = vmatmul.mubr.f32.vlgmr.msra.gmra.mxu0 %v1694_v41 }
 0x6d9   : > { %v2325_v24 = vpop.f32.mrf.mxu0 }
 0x6db   : > { %v1960_v42 = vpop.f32.mrf.mxu1 }
 0x6dc   : > { %2062 = vmatmul.mubr.f32.vlgmr.msra.gmra.mxu1 %v1960_v42 }
 0x6dd   : > { %v2335_v43 = vpop.f32.mrf.mxu1 }
 0x798   : > { %v1797_v45 = vpop.f32.mrf.mxu0 }
 0x799   : > { %v1804_v49 = vadd.f32 %v1797_v45, %v3963_v2 }
 0x79a   : > { %v1799_v48 = vpop.f32.mrf.mxu0 }
 0x79b   : > { %v1805_v52 = vadd.f32 %v1799_v48, %v3965_v6 }
 0x79c   : > { %v2063_v51 = vpop.f32.mrf.mxu1 }
 0x79d   : > { %v2070_v53 = vadd.f32 %v2063_v51, %v1804_v49 }
 0x79e   : > { %v2065_v55 = vpop.f32.mrf.mxu1 }
 0x79f   : > { %v2088_v56 = vadd.f32 %v2081_v50, %v2070_v53  ;;  %v2071_v57 = vadd.f32 %v2065_v55, %v1805_v52 }
 0x7a1   : > { %2090 = vst [vmem:[%s190_s30] sm:$0xff] %v2088_v56  ;;  %v2089_v58 = vadd.f32 %v2085_v54, %v2071_v57 }
 0x7a3   : > { %2091 = vst [vmem:[%s190_s30 + $0x8] sm:$0xff] %v2089_v58 }
 0x7a4   : > { %2409 = shalt.err (!%p2406_p3)
}
 0x7a5   : > { %s2410_s13 = scalar_lea.hbm %s2105_s8, 256  ;;  %s2414_s22 = scalar_lea.hbm %s4214_s4, 512 }
 0x7a6   : > { %p2411_p4 = scmp.ne.s32.totalorder %s2105_s8, %s2410_s13  ;;  %p2415_p9 = scmp.lt.s32.totalorder %s2105_s8, %s4214_s4 }
 0x7a7   : > { %p2416_p10 = scmp.lt.s32.totalorder %s2414_s22, %s2410_s13 }
 0x7a8   : > { %p2412_p7 = pnand %p2411_p4, %p2525_p5 }
 0x7a9   : > { %p2417_p11 = por %p2416_p10, %p2415_p9 }
 0x7aa   : > { %p2413_p8 = pneg %p2412_p7 }
 0x7ac   : > { %p2418_p12 = pnand %p2417_p11, %p2413_p8 }
 0x7ae   : > { %2421 = shalt.err (!%p2418_p12)
}
 0x7af   : > { %2336 = dma.vmem_to_hbm [thread:$0]  (%p2525_p5), %s2108_s5, 256, %s2105_s8, %s2093_s9  }
 0x7b0 PF: > { %p2342_p13 = scmp.ge.s32.totalorder %s2456_s18, 2  ;;  %s2119_s28 = sand.u32 1, %s2444_s15  }
 0x7b1   : > { %s2120_s29 = scalar_lea.sflag [#allocation4], %s2119_s28 }
 0x7b2   : > { %p2339_p0 = pnand %p2342_p13, %p2529_p6 }
 0x7b4   : > { %p2340_p1 = pneg %p2339_p0 }
 0x7b6   : > { %2439 = dma.done.wait (%p2340_p1), %s2120_s29, 256  }
 0x7b7   : > { %2441 = vsyncadd (%p2340_p1), %s2120_s29, 4294967040  ;;  %p14_p2 = scmp.ge.s32.totalorder %s2512_s21, 4   ;;  %s4217_s15 = smov %s2448_s16 }
 0x7b8   : > { %s4218_s16 = smov %s2452_s17  ;;  %s4219_s17 = smov %s2523_s24 }
 0x7b9   : > { %s4220_s18 = smov %s2512_s21  ;;  %16 = sbr.rel (!%p14_p2) target bundleno = 3 (0x3), region = 74 }
 0x7be   :  { %2125 = vsyncpa [#allocation4], 1 }
 0x7bf   :  { %2127 = vsyncpa [#allocation4 + $0x1], 1 }

</bundles_post_ra>
